<compile_context>
chip_gen: v7x
topology: tpu7x:2x2x1
jax: 0.10.0
libtpu: 0.0.40
codegen_flags: <defaults>
</compile_context>

<pallas_src>
import numpy as np
import jax
import jax.numpy as jnp
from jax.experimental import pallas as pl
from jax.experimental.pallas import tpu as pltpu

BN_EPS = 1e-5


# ---------------------------------------------------------------------------
# Kernels
# ---------------------------------------------------------------------------
def _unpool_kernel(x_ref, idx_ref, o_ref):
    """MaxUnpool2d(2,2) for one batch element.

    x_ref, idx_ref : (1, H, W, C)  (f32 / i32), NHWC
    o_ref          : (1, H, 2, W, 2, C); o[:, h, dh, :, dw, :] holds the value
                     landing at output position (2h+dh, 2w+dw), zero otherwise.
    """
    x = x_ref[...]
    idx = idx_ref[...]
    w = x.shape[2]
    w_out = 2 * w
    h_ids = jax.lax.broadcasted_iota(jnp.int32, x.shape, 1)
    w_ids = jax.lax.broadcasted_iota(jnp.int32, x.shape, 2)
    base = (2 * h_ids) * w_out + 2 * w_ids          # flat index of window's top-left
    for dh in range(2):
        for dw in range(2):
            hit = idx == (base + (dh * w_out + dw))
            o_ref[:, :, dh, :, dw, :] = jnp.where(hit, x, 0.0)


def _conv_core(x, w_ref, b_ref):
    """x: (TH+2, W+2, Cin) haloed zero-padded tile -> (TH*W, Cout) conv+bias (f32).

    9 taps concatenated along the channel axis (lane-dim preserved per slice),
    then ONE fused MXU matmul against the (9*Cin, Cout) resident weights.
    """
    th = x.shape[0] - 2
    w_out = x.shape[1] - 2
    cin = x.shape[2]
    m = th * w_out
    taps = jnp.concatenate(
        [x[kh:kh + th, kw:kw + w_out, :] for kh in range(3) for kw in range(3)],
        axis=-1)                                          # (TH, W, 9*Cin)
    a = taps.reshape(m, 9 * cin)                          # free leading-dim merge
    y = jnp.dot(a.astype(w_ref.dtype), w_ref[...],
                preferred_element_type=jnp.float32)       # single MXU matmul
    return y + b_ref[...]                                 # (M_tile, Cout), f32


def _emit_y_and_stats(y, y_ref, stats_ref):
    th, w_out, cout = y_ref.shape[1], y_ref.shape[2], y_ref.shape[3]
    y_ref[...] = y.reshape(1, th, w_out, cout)
    s = jnp.sum(y, axis=0, keepdims=True)                 # (1, Cout)
    ss = jnp.sum(y * y, axis=0, keepdims=True)            # (1, Cout)
    stats_ref[0, 0] = jnp.concatenate([s, ss], axis=0)    # (2, Cout)


def _conv_bias_stats_kernel(tile_ref, w_ref, b_ref, y_ref, stats_ref):
    """tile_ref: (1,1,TH+2,W+2,Cin); w_ref: (9*Cin,Cout); b_ref: (1,Cout)."""
    y = _conv_core(tile_ref[0, 0], w_ref, b_ref)
    _emit_y_and_stats(y, y_ref, stats_ref)


def _conv_prebn_bias_stats_kernel(tile_ref, w_ref, b_ref, scale_ref, shift_ref,
                                  y_ref, stats_ref):
    """Same as above, but the haloed tile is the *pre-BN* output of the previous
    conv: relu(scale*x + shift) is applied in-kernel and the zero-padding border
    is re-masked to 0 (since relu(scale*0 + shift) != 0 in general)."""
    yt = tile_ref[0, 0]                                   # (TH+2, W+2, Cin), f32
    cin = yt.shape[2]
    th = y_ref.shape[1]
    w_out = y_ref.shape[2]
    x = jnp.maximum(yt * scale_ref[...].reshape(1, 1, cin)
                    + shift_ref[...].reshape(1, 1, cin), 0.0)
    j = pl.program_id(1)
    h_total = th * pl.num_programs(1)
    r_ids = jax.lax.broadcasted_iota(jnp.int32, (th + 2, w_out + 2, 1), 0)
    c_ids = jax.lax.broadcasted_iota(jnp.int32, (th + 2, w_out + 2, 1), 1)
    gr = j * th + r_ids                                   # row index in padded map
    valid = (gr >= 1) & (gr <= h_total) & (c_ids >= 1) & (c_ids <= w_out)
    x = jnp.where(valid, x, 0.0)
    y = _conv_core(x, w_ref, b_ref)
    _emit_y_and_stats(y, y_ref, stats_ref)


def _bn_relu_kernel(y_ref, scale_ref, shift_ref, o_ref):
    """o = max(scale * y + shift, 0)  (scale/shift broadcast over Cout)."""
    o_ref[...] = jnp.maximum(y_ref[...] * scale_ref[...] + shift_ref[...], 0.0)


# ---------------------------------------------------------------------------
# Wrappers
# ---------------------------------------------------------------------------
def _pick_row_tile(h_out, w_out, target_rows):
    """Largest divisor of h_out with th * w_out roughly <= target_rows."""
    th = max(1, min(h_out, target_rows // max(1, w_out)))
    while h_out % th:
        th -= 1
    return th


def _haloed_row_tiles(x_nhwc, th):
    """(N, H, W, C) -> (N, H//th, th+2, W+2, C) zero-padded overlapping row tiles."""
    n, h, w, c = x_nhwc.shape
    xp = jnp.pad(x_nhwc, ((0, 0), (1, 1), (1, 1), (0, 0)))
    t = h // th
    return jnp.stack([xp[:, i * th:i * th + th + 2] for i in range(t)], axis=1)


def unpool_2x2(x_nchw, indices_nchw):
    """nn.MaxUnpool2d(2, 2). NCHW inputs -> NHWC output (N, 2H, 2W, C)."""
    n, c, h, w = x_nchw.shape
    x = jnp.transpose(x_nchw, (0, 2, 3, 1)).astype(jnp.float32)
    idx = jnp.transpose(indices_nchw, (0, 2, 3, 1)).astype(jnp.int32)
    out6 = pl.pallas_call(
        _unpool_kernel,
        grid=(n,),
        in_specs=[pl.BlockSpec((1, h, w, c), lambda i: (i, 0, 0, 0)),
                  pl.BlockSpec((1, h, w, c), lambda i: (i, 0, 0, 0))],
        out_specs=pl.BlockSpec((1, h, 2, w, 2, c),
                               lambda i: (i, 0, 0, 0, 0, 0)),
        out_shape=jax.ShapeDtypeStruct((n, h, 2, w, 2, c), jnp.float32),
        compiler_params=pltpu.CompilerParams(
            dimension_semantics=("parallel",)),
    )(x, idx)
    return out6.reshape(n, 2 * h, 2 * w, c)       # free contiguous view


def conv3x3_bias_stats(x_nhwc, w_oihw, bias, *, prebn=None,
                       matmul_dtype=jnp.float32, row_tile_target=1024):
    """3x3 pad-1 conv + bias; also emits per-tile channel [sum; sumsq] of the output.

    If prebn=(scale, shift) is given, relu(scale*x + shift) of the previous
    conv's pre-BN output is applied to the haloed tile in-kernel, so the
    normalized intermediate never round-trips HBM."""
    n, h, w, cin = x_nhwc.shape
    cout = w_oihw.shape[0]
    th = _pick_row_tile(h, w, row_tile_target)
    t = h // th

    tile_dtype = jnp.float32 if prebn is not None else matmul_dtype
    tiles = _haloed_row_tiles(x_nhwc, th).astype(tile_dtype)     # (N,T,TH+2,W+2,Cin)
    wk = (jnp.transpose(w_oihw, (2, 3, 1, 0))
          .reshape(9 * cin, cout).astype(matmul_dtype))          # (9*Cin, Cout)
    b2 = bias.reshape(1, cout).astype(jnp.float32)

    resident = lambda i, j: (0, 0)                               # weights stay put
    in_specs = [
        pl.BlockSpec((1, 1, th + 2, w + 2, cin), lambda i, j: (i, j, 0, 0, 0)),
        pl.BlockSpec((9 * cin, cout), resident),
        pl.BlockSpec((1, cout), resident),
    ]
    args = [tiles, wk, b2]
    if prebn is None:
        kernel = _conv_bias_stats_kernel
    else:
        scale, shift = prebn
        in_specs += [pl.BlockSpec((1, cin), resident),
                     pl.BlockSpec((1, cin), resident)]
        args += [scale.reshape(1, cin).astype(jnp.float32),
                 shift.reshape(1, cin).astype(jnp.float32)]
        kernel = _conv_prebn_bias_stats_kernel

    y, stats = pl.pallas_call(
        kernel,
        grid=(n, t),
        in_specs=in_specs,
        out_specs=(
            pl.BlockSpec((1, th, w, cout), lambda i, j: (i, j, 0, 0)),
            pl.BlockSpec((1, 1, 2, cout), lambda i, j: (i, j, 0, 0)),
        ),
        out_shape=(
            jax.ShapeDtypeStruct((n, h, w, cout), jnp.float32),
            jax.ShapeDtypeStruct((n, t, 2, cout), jnp.float32),
        ),
        compiler_params=pltpu.CompilerParams(
            dimension_semantics=("parallel", "parallel")),
    )(*args)
    return y, stats


def _bn_scale_shift(stats, gamma, beta, count):
    """Exact global batch statistics from per-tile partial sums (tiny XLA op)."""
    total = jnp.sum(stats, axis=(0, 1))                  # (2, Cout)
    mean = total[0] / count
    var = jnp.maximum(total[1] / count - mean * mean, 0.0)
    inv_std = jax.lax.rsqrt(var + BN_EPS)
    scale = gamma * inv_std
    shift = beta - mean * scale
    return scale, shift


def bn_relu(y_nhwc, scale, shift, *, row_tile_target=1024):
    """Tiled elementwise max(scale*y + shift, 0)."""
    n, h, w, cout = y_nhwc.shape
    th = _pick_row_tile(h, w, row_tile_target)
    t = h // th
    resident = lambda i, j: (0, 0)
    return pl.pallas_call(
        _bn_relu_kernel,
        grid=(n, t),
        in_specs=[pl.BlockSpec((1, th, w, cout), lambda i, j: (i, j, 0, 0)),
                  pl.BlockSpec((1, cout), resident),
                  pl.BlockSpec((1, cout), resident)],
        out_specs=pl.BlockSpec((1, th, w, cout), lambda i, j: (i, j, 0, 0)),
        out_shape=jax.ShapeDtypeStruct((n, h, w, cout), jnp.float32),
        compiler_params=pltpu.CompilerParams(
            dimension_semantics=("parallel", "parallel")),
    )(y_nhwc, scale.reshape(1, cout).astype(jnp.float32),
      shift.reshape(1, cout).astype(jnp.float32))


def segnet_up2_forward(params, inputs_nchw, indices_nchw, output_shape, *,
                       last_layer=False, matmul_dtype=jnp.float32,
                       row_tile_target=1024):
    """segnetUp2(in_size, out_size, last_layer, withSkipConnections=False).forward"""
    n, c, h, w = inputs_nchw.shape
    assert tuple(output_shape) == (n, c, 2 * h, 2 * w)
    ho, wo = 2 * h, 2 * w
    count = float(n * ho * wo)

    x0 = unpool_2x2(inputs_nchw, indices_nchw)                         # NHWC

    # conv1 (+bias) and its batch stats; BN1+ReLU is deferred into conv2's pass.
    y1, st1 = conv3x3_bias_stats(x0, params["w1"], params["b1"],
                                 matmul_dtype=matmul_dtype,
                                 row_tile_target=row_tile_target)
    scale1, shift1 = _bn_scale_shift(st1, params["g1"], params["bt1"], count)

    # conv2 consumes pre-BN y1 tiles, applying BN1+ReLU (and pad re-mask) in-kernel.
    y2, st2 = conv3x3_bias_stats(y1, params["w2"], params["b2"],
                                 prebn=(scale1, shift1),
                                 matmul_dtype=matmul_dtype,
                                 row_tile_target=row_tile_target)
    if last_layer:
        out = y2                                   # bare Conv2d output (no BN/ReLU)
    else:
        scale2, shift2 = _bn_scale_shift(st2, params["g2"], params["bt2"], count)
        out = bn_relu(y2, scale2, shift2, row_tile_target=row_tile_target)
    return jnp.transpose(out, (0, 3, 1, 2))                            # NCHW
    # TODO(synk): withSkipConnections variant (channel-concat of SkipFeatureMap
    # with the unpooled map before conv1) not exercised here.


# ---------------------------------------------------------------------------
# Deterministic parameter init (shapes from the module __init__)
# ---------------------------------------------------------------------------
def init_params(key, in_size, out_size):
    k1, k2, k3, k4 = jax.random.split(key, 4)
    w1 = jax.random.normal(k1, (in_size, in_size, 3, 3), jnp.float32) \
        / np.sqrt(9.0 * in_size)
    b1 = 0.1 * jax.random.normal(k2, (in_size,), jnp.float32)
    w2 = jax.random.normal(k3, (out_size, in_size, 3, 3), jnp.float32) \
        / np.sqrt(9.0 * in_size)
    b2 = 0.1 * jax.random.normal(k4, (out_size,), jnp.float32)
    g1 = 1.0 + 0.1 * jnp.arange(in_size, dtype=jnp.float32)
    bt1 = 0.05 * jnp.arange(in_size, dtype=jnp.float32)
    g2 = 1.0 + 0.1 * jnp.arange(out_size, dtype=jnp.float32)
    bt2 = 0.05 * jnp.arange(out_size, dtype=jnp.float32)
    return dict(w1=w1, b1=b1, g1=g1, bt1=bt1,
                w2=w2, b2=b2, g2=g2, bt2=bt2)


# ---------------------------------------------------------------------------
# Pure-JAX / numpy reference for verification
# ---------------------------------------------------------------------------
def reference_forward(params, x_nchw, idx_nchw):
    x = np.asarray(x_nchw)
    idx = np.asarray(idx_nchw)
    n, c, h, w = x.shape
    ho, wo = 2 * h, 2 * w
    up = np.zeros((n, c, ho * wo), np.float32)
    for ni in range(n):
        for ci in range(c):
            up[ni, ci, idx[ni, ci].reshape(-1)] = x[ni, ci].reshape(-1)
    up = jnp.asarray(up.reshape(n, c, ho, wo))

    def cbr(y, wgt, b, g, bt):
        y = jax.lax.conv_general_dilated(
            y, wgt, (1, 1), ((1, 1), (1, 1)),
            dimension_numbers=("NCHW", "OIHW", "NCHW"))
        y = y + b[None, :, None, None]
        mean = jnp.mean(y, axis=(0, 2, 3), keepdims=True)
        var = jnp.mean((y - mean) ** 2, axis=(0, 2, 3), keepdims=True)
        y = g[None, :, None, None] * (y - mean) / jnp.sqrt(var + BN_EPS) \
            + bt[None, :, None, None]
        return jnp.maximum(y, 0.0)

    y = cbr(up, params["w1"], params["b1"], params["g1"], params["bt1"])
    y = cbr(y, params["w2"], params["b2"], params["g2"], params["bt2"])
    return y


# ---------------------------------------------------------------------------
if __name__ == "__main__":
    N, IN_SIZE, OUT_SIZE, H, W = 2, 4, 3, 8, 8

    key = jax.random.PRNGKey(0)
    kp, kx, kdh, kdw = jax.random.split(key, 4)
    params = init_params(kp, IN_SIZE, OUT_SIZE)

    inputs = jax.random.normal(kx, (N, IN_SIZE, H, W), jnp.float32)
    # Synthetic MaxPool2d(2,2) indices: one position per 2x2 output window.
    dh = jax.random.randint(kdh, (N, IN_SIZE, H, W), 0, 2)
    dw = jax.random.randint(kdw, (N, IN_SIZE, H, W), 0, 2)
    hh = jnp.arange(H)[None, None, :, None]
    ww = jnp.arange(W)[None, None, None, :]
    indices = ((2 * hh + dh) * (2 * W) + (2 * ww + dw)).astype(jnp.int32)

    output_shape = (N, IN_SIZE, 2 * H, 2 * W)

    # row_tile_target=64 forces multiple row tiles (TH=4, T=4 at 16x16 output)
    # so the tiled/haloed grid path, cross-tile BN stats, and the in-kernel
    # BN1+ReLU padding re-mask (first/interior/last tiles) are all exercised.
    out = segnet_up2_forward(params, inputs, indices, output_shape,
                             row_tile_target=64)
    out = jax.block_until_ready(out)

    ref = reference_forward(params, inputs, indices)
    assert out.shape == (N, OUT_SIZE, 2 * H, 2 * W), out.shape
    np.testing.assert_allclose(np.asarray(out), np.asarray(ref),
                               atol=1e-3, rtol=1e-3)
    print("KERNEL_OK")
</pallas_src>

<mosaic_0001>
module attributes {stable_mosaic.version = 11 : i64} {
  func.func @_unpool_kernel(%arg0: i32, %arg1: memref<1x8x8x4xf32, #tpu.memory_space<vmem>>, %arg2: memref<1x8x8x4xi32, #tpu.memory_space<vmem>>, %arg3: memref<1x8x2x8x2x4xf32, #tpu.memory_space<vmem>>) attributes {dimension_semantics = [#tpu.dimension_semantics<parallel>], iteration_bounds = array<i64: 2>, scalar_prefetch = 0 : i64, scratch_operands = 0 : i64, tpu.core_type = #tpu.core_type<tc>, window_params = [{transform_indices = @transform_0, window_bounds = array<i64: 1, 8, 8, 4>}, {transform_indices = @transform_1, window_bounds = array<i64: 1, 8, 8, 4>}, {transform_indices = @transform_2, window_bounds = array<i64: 1, 8, 2, 8, 2, 4>}]} {
    %c0 = arith.constant 0 : index
    %c0_0 = arith.constant 0 : index
    %c0_1 = arith.constant 0 : index
    %c0_2 = arith.constant 0 : index
    %0 = vector.load %arg1[%c0, %c0_0, %c0_1, %c0_2] : memref<1x8x8x4xf32, #tpu.memory_space<vmem>>, vector<1x8x8x4xf32>
    %c0_3 = arith.constant 0 : index
    %c0_4 = arith.constant 0 : index
    %c0_5 = arith.constant 0 : index
    %c0_6 = arith.constant 0 : index
    %1 = vector.load %arg2[%c0_3, %c0_4, %c0_5, %c0_6] : memref<1x8x8x4xi32, #tpu.memory_space<vmem>>, vector<1x8x8x4xi32>
    %2 = tpu.iota {dimensions = array<i32: 1>} : vector<1x8x8x4xi32>
    %3 = tpu.iota {dimensions = array<i32: 2>} : vector<1x8x8x4xi32>
    %c2_i32 = arith.constant 2 : i32
    %4 = vector.broadcast %c2_i32 : i32 to vector<1x8x8x4xi32>
    %5 = arith.muli %4, %2 : vector<1x8x8x4xi32>
    %c16_i32 = arith.constant 16 : i32
    %6 = vector.broadcast %c16_i32 : i32 to vector<1x8x8x4xi32>
    %7 = arith.muli %5, %6 : vector<1x8x8x4xi32>
    %c2_i32_7 = arith.constant 2 : i32
    %8 = vector.broadcast %c2_i32_7 : i32 to vector<1x8x8x4xi32>
    %9 = arith.muli %8, %3 : vector<1x8x8x4xi32>
    %10 = arith.addi %7, %9 : vector<1x8x8x4xi32>
    %c0_i32 = arith.constant 0 : i32
    %11 = vector.broadcast %c0_i32 : i32 to vector<1x8x8x4xi32>
    %12 = arith.addi %10, %11 : vector<1x8x8x4xi32>
    %13 = arith.cmpi eq, %1, %12 : vector<1x8x8x4xi32>
    %cst = arith.constant 0.000000e+00 : f32
    %14 = vector.broadcast %cst : f32 to vector<1x8x8x4xf32>
    %15 = arith.select %13, %0, %14 : vector<1x8x8x4xi1>, vector<1x8x8x4xf32>
    %c0_8 = arith.constant 0 : index
    %c0_9 = arith.constant 0 : index
    %c0_10 = arith.constant 0 : index
    %c0_11 = arith.constant 0 : index
    %c0_12 = arith.constant 0 : index
    %c0_13 = arith.constant 0 : index
    %16 = vector.load %arg3[%c0_8, %c0_9, %c0_10, %c0_11, %c0_12, %c0_13] : memref<1x8x2x8x2x4xf32, #tpu.memory_space<vmem>>, vector<1x8x1x8x1x4xf32>
    %17 = vector.shape_cast %16 : vector<1x8x1x8x1x4xf32> to vector<1x8x8x4xf32>
    %18 = vector.shape_cast %15 : vector<1x8x8x4xf32> to vector<1x8x1x8x1x4xf32>
    tpu.vector_store %arg3[%c0_8, %c0_9, %c0_10, %c0_11, %c0_12, %c0_13], %18 {strides = array<i32>} : memref<1x8x2x8x2x4xf32, #tpu.memory_space<vmem>>, vector<1x8x1x8x1x4xf32>,
    %c1_i32 = arith.constant 1 : i32
    %19 = vector.broadcast %c1_i32 : i32 to vector<1x8x8x4xi32>
    %20 = arith.addi %10, %19 : vector<1x8x8x4xi32>
    %21 = arith.cmpi eq, %1, %20 : vector<1x8x8x4xi32>
    %cst_14 = arith.constant 0.000000e+00 : f32
    %22 = vector.broadcast %cst_14 : f32 to vector<1x8x8x4xf32>
    %23 = arith.select %21, %0, %22 : vector<1x8x8x4xi1>, vector<1x8x8x4xf32>
    %c0_15 = arith.constant 0 : index
    %c0_16 = arith.constant 0 : index
    %c0_17 = arith.constant 0 : index
    %c0_18 = arith.constant 0 : index
    %c1 = arith.constant 1 : index
    %c0_19 = arith.constant 0 : index
    %24 = vector.load %arg3[%c0_15, %c0_16, %c0_17, %c0_18, %c1, %c0_19] : memref<1x8x2x8x2x4xf32, #tpu.memory_space<vmem>>, vector<1x8x1x8x1x4xf32>
    %25 = vector.shape_cast %24 : vector<1x8x1x8x1x4xf32> to vector<1x8x8x4xf32>
    %26 = vector.shape_cast %23 : vector<1x8x8x4xf32> to vector<1x8x1x8x1x4xf32>
    tpu.vector_store %arg3[%c0_15, %c0_16, %c0_17, %c0_18, %c1, %c0_19], %26 {strides = array<i32>} : memref<1x8x2x8x2x4xf32, #tpu.memory_space<vmem>>, vector<1x8x1x8x1x4xf32>,
    %c16_i32_20 = arith.constant 16 : i32
    %27 = vector.broadcast %c16_i32_20 : i32 to vector<1x8x8x4xi32>
    %28 = arith.addi %10, %27 : vector<1x8x8x4xi32>
    %29 = arith.cmpi eq, %1, %28 : vector<1x8x8x4xi32>
    %cst_21 = arith.constant 0.000000e+00 : f32
    %30 = vector.broadcast %cst_21 : f32 to vector<1x8x8x4xf32>
    %31 = arith.select %29, %0, %30 : vector<1x8x8x4xi1>, vector<1x8x8x4xf32>
    %c0_22 = arith.constant 0 : index
    %c0_23 = arith.constant 0 : index
    %c1_24 = arith.constant 1 : index
    %c0_25 = arith.constant 0 : index
    %c0_26 = arith.constant 0 : index
    %c0_27 = arith.constant 0 : index
    %32 = vector.load %arg3[%c0_22, %c0_23, %c1_24, %c0_25, %c0_26, %c0_27] : memref<1x8x2x8x2x4xf32, #tpu.memory_space<vmem>>, vector<1x8x1x8x1x4xf32>
    %33 = vector.shape_cast %32 : vector<1x8x1x8x1x4xf32> to vector<1x8x8x4xf32>
    %34 = vector.shape_cast %31 : vector<1x8x8x4xf32> to vector<1x8x1x8x1x4xf32>
    tpu.vector_store %arg3[%c0_22, %c0_23, %c1_24, %c0_25, %c0_26, %c0_27], %34 {strides = array<i32>} : memref<1x8x2x8x2x4xf32, #tpu.memory_space<vmem>>, vector<1x8x1x8x1x4xf32>,
    %c17_i32 = arith.constant 17 : i32
    %35 = vector.broadcast %c17_i32 : i32 to vector<1x8x8x4xi32>
    %36 = arith.addi %10, %35 : vector<1x8x8x4xi32>
    %37 = arith.cmpi eq, %1, %36 : vector<1x8x8x4xi32>
    %cst_28 = arith.constant 0.000000e+00 : f32
    %38 = vector.broadcast %cst_28 : f32 to vector<1x8x8x4xf32>
    %39 = arith.select %37, %0, %38 : vector<1x8x8x4xi1>, vector<1x8x8x4xf32>
    %c0_29 = arith.constant 0 : index
    %c0_30 = arith.constant 0 : index
    %c1_31 = arith.constant 1 : index
    %c0_32 = arith.constant 0 : index
    %c1_33 = arith.constant 1 : index
    %c0_34 = arith.constant 0 : index
    %40 = vector.load %arg3[%c0_29, %c0_30, %c1_31, %c0_32, %c1_33, %c0_34] : memref<1x8x2x8x2x4xf32, #tpu.memory_space<vmem>>, vector<1x8x1x8x1x4xf32>
    %41 = vector.shape_cast %40 : vector<1x8x1x8x1x4xf32> to vector<1x8x8x4xf32>
    %42 = vector.shape_cast %39 : vector<1x8x8x4xf32> to vector<1x8x1x8x1x4xf32>
    tpu.vector_store %arg3[%c0_29, %c0_30, %c1_31, %c0_32, %c1_33, %c0_34], %42 {strides = array<i32>} : memref<1x8x2x8x2x4xf32, #tpu.memory_space<vmem>>, vector<1x8x1x8x1x4xf32>,
    return
  }
  func.func @transform_0(%arg0: i32) -> (i32, i32, i32, i32) {
    %c0_i32 = arith.constant 0 : i32
    %c0_i32_0 = arith.constant 0 : i32
    %c0_i32_1 = arith.constant 0 : i32
    %c0_i32_2 = arith.constant 0 : i32
    return %arg0, %c0_i32, %c0_i32_0, %c0_i32_1 : i32, i32, i32, i32
  }
  func.func @transform_1(%arg0: i32) -> (i32, i32, i32, i32) {
    %c0_i32 = arith.constant 0 : i32
    %c0_i32_0 = arith.constant 0 : i32
    %c0_i32_1 = arith.constant 0 : i32
    %c0_i32_2 = arith.constant 0 : i32
    return %arg0, %c0_i32, %c0_i32_0, %c0_i32_1 : i32, i32, i32, i32
  }
  func.func @transform_2(%arg0: i32) -> (i32, i32, i32, i32, i32, i32) {
    %c0_i32 = arith.constant 0 : i32
    %c0_i32_0 = arith.constant 0 : i32
    %c0_i32_1 = arith.constant 0 : i32
    %c0_i32_2 = arith.constant 0 : i32
    %c0_i32_3 = arith.constant 0 : i32
    %c0_i32_4 = arith.constant 0 : i32
    return %arg0, %c0_i32, %c0_i32_0, %c0_i32_1, %c0_i32_2, %c0_i32_3 : i32, i32, i32, i32, i32, i32
  }
}

</mosaic_0001>

<bundles_post_ra>
// kernel: tpu_custom_call.1
= control target key start
LH: loop header
LB: loop body
LE: loop exit
PB: predicated region body
PF: predicated region fallthrough
CT: control target
= control target key end

     0   :  { %s2652_s9 = smov 0   ;;  %s3573_s0 = inlined_call_operand.vmem [shape: f32[2,8,8,4], index: 0, kind: input, shape index: {}]   ;;  %s3574_s1 = inlined_call_operand.vmem [shape: s32[2,8,8,4], index: 1, kind: input, shape index: {}]   ;;  %s3575_s2 = inlined_call_operand.vmem [shape: f32[2,8,2,8,2,4], index: 2, kind: output, shape index: {}]  }
   0x1 LB: > { %s2459_s10 = sadd.s32 4294967295, %s2634_s9   ;;  %p2463_p0 = scmp.ge.s32.totalorder %s2634_s9, 1  ;;  %s2634_s9 = sphi %s2652_s9, %s12_s9  }
   0x2   : > { %p122_p1 = scmp.lt.s32.totalorder %s2634_s9, 3 }
   0x4   : > { %p123_p2 = pnand %p2463_p0, %p122_p1 }
   0x5   : > { %p149_p3 = scmp.lt.s32.totalorder (!%p123_p2), %s2459_s10, 1  ;;  %v180_v0 = vlaneseq (!%p123_p2)  ;;  %v2636_v1 = vmov (!%p123_p2), 1966171168   ;;  %vm670_vm0 = vcmask (!%p123_p2), 24576  }
   0x6   : > { %126 = sbr.rel (%p123_p2) target bundleno = 165 (0xa5), region = 28  ;;  %v216_v2 = vunpack.c.l.s4 (!%p123_p2), %v2636_v1 }
   0x7   : > { %v181_v3 = vshrl.u32 (!%p123_p2), %v180_v0, 7 }
   0x8   : > { %v217_v4 = vunpack.c.0.s8 (!%p123_p2), %v216_v2 }
   0x9   : > { %v2664_v5 = vmul.u32 (!%p123_p2), 2, %v181_v3 }
   0xa   : > { %v2676_v6 = vsub.s32 (!%p123_p2), %v217_v4, %v181_v3 }
   0xb   : > { %v2688_v10 = vadd.s32 (!%p123_p2), 32, %v2664_v5  ;;  %v2691_v11 = vadd.s32 (!%p123_p2), 64, %v2664_v5  ;;  %v2694_v12 = vadd.s32 (!%p123_p2), 96, %v2664_v5  ;;  %v2708_v16 = vadd.s32 (!%p123_p2), 128, %v2664_v5 }
   0xc   : > { %v2711_v17 = vadd.s32 (!%p123_p2), 160, %v2664_v5  ;;  %v2714_v18 = vadd.s32 (!%p123_p2), 192, %v2664_v5  ;;  %v2725_v21 = vadd.s32 (!%p123_p2), 224, %v2664_v5 }
   0xd   : > { %s3577_s10 = smov (!%p149_p3, %s2459_s10), 1 }
   0xe   : > { %s2600_s11 = sshll.u32 %s3577_s10, 6  ;;  %s2602_s12 = sshll.u32 %s3577_s10, 8 }
   0xf   : > { %s2669_s15 = scalar_lea.vmem %s3573_s0, %s2600_s11  ;;  %s2674_s18 = scalar_lea.vmem %s3574_s1, %s2600_s11 }
  0x10   : > { %v2679_v7 = vld [vmem:[%s2669_s15] sm:$0xff]  ;;  %v2685_v9 = vld [vmem:[%s2669_s15 + $0x8] sm:$0xff]  ;;  %v2702_v14 = vld [vmem:[%s2669_s15 + $0x10] sm:$0xff]  ;;  %s2733_s21 = scalar_lea.vmem %s3575_s2, %s2602_s12 }
  0x11   : > { %v2682_v8 = vld [vmem:[%s2674_s18] sm:$0xff]  ;;  %v2699_v13 = vld [vmem:[%s2674_s18 + $0x8] sm:$0xff]  ;;  %v2705_v15 = vld [vmem:[%s2674_s18 + $0x10] sm:$0xff] }
  0x12   : > { %vm190_vm1 = vcmp.eq.s32.totalorder %v2682_v8, %v2664_v5  ;;  %vm191_vm2 = vcmp.eq.s32.totalorder %v2699_v13, %v2688_v10  ;;  %vm192_vm3 = vcmp.eq.s32.totalorder %v2705_v15, %v2691_v11  ;;  %v2722_v20 = vld [vmem:[%s2674_s18 + $0x18] sm:$0xff]  ;;  %v2765_v50 = vld [vmem:[%s2674_s18 + $0x20] sm:$0xff]  ;;  %v2801_v63 = vld [vmem:[%s2674_s18 + $0x28] sm:$0xff] }
  0x13   : > { %v198_v19 = vsel %vm190_vm1, %v2679_v7, 0.0  ;;  %v199_v24 = vsel %vm191_vm2, %v2685_v9, 0.0  ;;  %v200_v25 = vsel %vm192_vm3, %v2702_v14, 0.0  ;;  %vm193_vm4 = vcmp.eq.s32.totalorder %v2722_v20, %v2694_v12  ;;  %v2755_v45 = vld [vmem:[%s2669_s15 + $0x18] sm:$0xff]  ;;  %v2775_v55 = vld [vmem:[%s2669_s15 + $0x20] sm:$0xff] }
  0x14   : > { %v221_v22 = vrot.slane %v198_v19, %v2676_v6  ;;  %v214_v23 = vcombine.high %v198_v19, %v198_v19  ;;  %v270_v26 = vrot.slane %v199_v24, %v2676_v6  ;;  %v263_v27 = vcombine.high %v199_v24, %v199_v24 }
  0x15   : > { %v319_v28 = vrot.slane %v200_v25, %v2676_v6  ;;  %v312_v29 = vcombine.high %v200_v25, %v200_v25  ;;  %v201_v59 = vsel %vm193_vm4, %v2755_v45, 0.0  ;;  %vm194_vm5 = vcmp.eq.s32.totalorder %v2765_v50, %v2708_v16 }
  0x16   : > { %v237_v30 = vrot.slane %v221_v22, %v2676_v6  ;;  %v229_v31 = vcombine.high %v221_v22, %v221_v22  ;;  %v228_v32 = vrot.slane %v214_v23, %v2676_v6  ;;  %v286_v33 = vrot.slane %v270_v26, %v2676_v6 }
  0x17   : > { %v278_v34 = vcombine.high %v270_v26, %v270_v26  ;;  %v277_v35 = vrot.slane %v263_v27, %v2676_v6  ;;  %v335_v36 = vrot.slane %v319_v28, %v2676_v6  ;;  %v327_v49 = vcombine.high %v319_v28, %v319_v28  ;;  %v2820_v27 = vld [vmem:[%s2669_s15 + $0x28] sm:$0xff] }
  0x18   : > { %671 = vst.msk [vmem:[%s2733_s21] sm:$0x1] %vm670_vm0, %v237_v30  ;;  %v251_v37 = vrot.slane %v229_v31, %v2676_v6  ;;  %v259_v38 = vcombine.high %v237_v30, %v237_v30  ;;  %v244_v39 = vrot.slane %v228_v32, %v2676_v6  ;;  %v230_v40 = vcombine.high %v228_v32, %v228_v32 }
  0x19   : > { %679 = vst.msk [vmem:[%s2733_s21 + $0x20] sm:$0x1] %vm670_vm0, %v286_v33  ;;  %v300_v41 = vrot.slane %v278_v34, %v2676_v6  ;;  %v308_v42 = vcombine.high %v286_v33, %v286_v33  ;;  %v293_v43 = vrot.slane %v277_v35, %v2676_v6  ;;  %v279_v44 = vcombine.high %v277_v35, %v277_v35 }
  0x1a   : > { %687 = vst.msk [vmem:[%s2733_s21 + $0x40] sm:$0x1] %vm670_vm0, %v335_v36  ;;  %672 = vst.msk [vmem:[%s2733_s21 + $0x2] sm:$0x1] %vm670_vm0, %v251_v37  ;;  %v261_v46 = vcombine.high %v251_v37, %v251_v37  ;;  %v258_v47 = vrot.slane %v230_v40, %v2676_v6  ;;  %v260_v48 = vcombine.high %v244_v39, %v244_v39  ;;  %v202_v3 = vsel %vm194_vm5, %v2775_v55, 0.0 }
  0x1b   : > { %673 = vst.msk [vmem:[%s2733_s21 + $0x4] sm:$0x1] %vm670_vm0, %v259_v38  ;;  %675 = vst.msk [vmem:[%s2733_s21 + $0x8] sm:$0x1] %vm670_vm0, %v244_v39  ;;  %v310_v51 = vcombine.high %v300_v41, %v300_v41  ;;  %v307_v52 = vrot.slane %v279_v44, %v2676_v6  ;;  %v309_v53 = vcombine.high %v293_v43, %v293_v43 }
  0x1c   : > { %680 = vst.msk [vmem:[%s2733_s21 + $0x22] sm:$0x1] %vm670_vm0, %v300_v41  ;;  %681 = vst.msk [vmem:[%s2733_s21 + $0x24] sm:$0x1] %vm670_vm0, %v308_v42  ;;  %v357_v54 = vcombine.high %v335_v36, %v335_v36  ;;  %v262_v56 = vcombine.high %v258_v47, %v258_v47  ;;  %v349_v57 = vrot.slane %v327_v49, %v2676_v6  ;;  %v2835_v36 = vld [vmem:[%s2674_s18 + $0x30] sm:$0xff] }
  0x1d   : > { %683 = vst.msk [vmem:[%s2733_s21 + $0x28] sm:$0x1] %vm670_vm0, %v293_v43  ;;  %674 = vst.msk [vmem:[%s2733_s21 + $0x6] sm:$0x1] %vm670_vm0, %v261_v46  ;;  %v326_v58 = vrot.slane %v312_v29, %v2676_v6  ;;  %v311_v60 = vcombine.high %v307_v52, %v307_v52  ;;  %v368_v61 = vrot.slane %v201_v59, %v2676_v6  ;;  %v2849_v41 = vld [vmem:[%s2669_s15 + $0x30] sm:$0xff] }
  0x1e   : > { %676 = vst.msk [vmem:[%s2733_s21 + $0xa] sm:$0x1] %vm670_vm0, %v258_v47  ;;  %677 = vst.msk [vmem:[%s2733_s21 + $0xc] sm:$0x1] %vm670_vm0, %v260_v48  ;;  %v361_v62 = vcombine.high %v201_v59, %v201_v59  ;;  %v359_v0 = vcombine.high %v349_v57, %v349_v57  ;;  %v417_v23 = vrot.slane %v202_v3, %v2676_v6 }
  0x1f   : > { %682 = vst.msk [vmem:[%s2733_s21 + $0x26] sm:$0x1] %vm670_vm0, %v310_v51  ;;  %684 = vst.msk [vmem:[%s2733_s21 + $0x2a] sm:$0x1] %vm670_vm0, %v307_v52  ;;  %v342_v1 = vrot.slane %v326_v58, %v2676_v6  ;;  %v328_v2 = vcombine.high %v326_v58, %v326_v58  ;;  %v384_v4 = vrot.slane %v368_v61, %v2676_v6  ;;  %v2867_v51 = vld [vmem:[%s2674_s18 + $0x38] sm:$0xff] }
  0x20   : > { %685 = vst.msk [vmem:[%s2733_s21 + $0x2c] sm:$0x1] %vm670_vm0, %v309_v53  ;;  %689 = vst.msk [vmem:[%s2733_s21 + $0x44] sm:$0x1] %vm670_vm0, %v357_v54  ;;  %v376_v19 = vcombine.high %v368_v61, %v368_v61  ;;  %v375_v22 = vrot.slane %v361_v62, %v2676_v6  ;;  %v410_v26 = vcombine.high %v202_v3, %v202_v3  ;;  %v2883_v61 = vld [vmem:[%s2669_s15 + $0x38] sm:$0xff] }
  0x21   : > { %678 = vst.msk [vmem:[%s2733_s21 + $0xe] sm:$0x1] %vm670_vm0, %v262_v56  ;;  %688 = vst.msk [vmem:[%s2733_s21 + $0x42] sm:$0x1] %vm670_vm0, %v349_v57  ;;  %v356_v24 = vrot.slane %v328_v2, %v2676_v6  ;;  %v358_v25 = vcombine.high %v342_v1, %v342_v1  ;;  %vm195_vm6 = vcmp.eq.s32.totalorder %v2801_v63, %v2711_v17 }
  0x22   : > { %686 = vst.msk [vmem:[%s2733_s21 + $0x2e] sm:$0x1] %vm670_vm0, %v311_v60  ;;  %690 = vst.msk [vmem:[%s2733_s21 + $0x46] sm:$0x1] %vm670_vm0, %v359_v0  ;;  %v398_v28 = vrot.slane %v376_v19, %v2676_v6  ;;  %v406_v29 = vcombine.high %v384_v4, %v384_v4  ;;  %v391_v30 = vrot.slane %v375_v22, %v2676_v6  ;;  %v203_v40 = vsel %vm195_vm6, %v2820_v27, 0.0 }
  0x23   : > { %691 = vst.msk [vmem:[%s2733_s21 + $0x48] sm:$0x1] %vm670_vm0, %v342_v1  ;;  %695 = vst.msk [vmem:[%s2733_s21 + $0x60] sm:$0x1] %vm670_vm0, %v384_v4  ;;  %v377_v31 = vcombine.high %v375_v22, %v375_v22  ;;  %v360_v32 = vcombine.high %v356_v24, %v356_v24  ;;  %v433_v33 = vrot.slane %v417_v23, %v2676_v6  ;;  %v735_v1 = vadd.s32 1, %v2664_v5 }
  0x24   : > { %692 = vst.msk [vmem:[%s2733_s21 + $0x4a] sm:$0x1] %vm670_vm0, %v356_v24  ;;  %693 = vst.msk [vmem:[%s2733_s21 + $0x4c] sm:$0x1] %vm670_vm0, %v358_v25  ;;  %v425_v34 = vcombine.high %v417_v23, %v417_v23  ;;  %v424_v35 = vrot.slane %v410_v26, %v2676_v6  ;;  %v408_v37 = vcombine.high %v398_v28, %v398_v28 }
  0x25   : > { %696 = vst.msk [vmem:[%s2733_s21 + $0x62] sm:$0x1] %vm670_vm0, %v398_v28  ;;  %697 = vst.msk [vmem:[%s2733_s21 + $0x64] sm:$0x1] %vm670_vm0, %v406_v29  ;;  %v405_v38 = vrot.slane %v377_v31, %v2676_v6  ;;  %v407_v39 = vcombine.high %v391_v30, %v391_v30  ;;  %v455_v43 = vcombine.high %v433_v33, %v433_v33 }
  0x26   : > { %699 = vst.msk [vmem:[%s2733_s21 + $0x68] sm:$0x1] %vm670_vm0, %v391_v30  ;;  %694 = vst.msk [vmem:[%s2733_s21 + $0x4e] sm:$0x1] %vm670_vm0, %v360_v32  ;;  %v447_v42 = vrot.slane %v425_v34, %v2676_v6  ;;  %v440_v44 = vrot.slane %v424_v35, %v2676_v6  ;;  %v426_v46 = vcombine.high %v424_v35, %v424_v35 }
  0x27   : > { %703 = vst.msk [vmem:[%s2733_s21 + $0x80] sm:$0x1] %vm670_vm0, %v433_v33  ;;  %698 = vst.msk [vmem:[%s2733_s21 + $0x66] sm:$0x1] %vm670_vm0, %v408_v37  ;;  %v409_v47 = vcombine.high %v405_v38, %v405_v38  ;;  %v466_v48 = vrot.slane %v203_v40, %v2676_v6  ;;  %v459_v49 = vcombine.high %v203_v40, %v203_v40 }
  0x28   : > { %700 = vst.msk [vmem:[%s2733_s21 + $0x6a] sm:$0x1] %vm670_vm0, %v405_v38  ;;  %701 = vst.msk [vmem:[%s2733_s21 + $0x6c] sm:$0x1] %vm670_vm0, %v407_v39  ;;  %vm196_vm7 = vcmp.eq.s32.totalorder %v2835_v36, %v2714_v18  ;;  %v457_v52 = vcombine.high %v447_v42, %v447_v42  ;;  %v454_v53 = vrot.slane %v426_v46, %v2676_v6 }
  0x29   : > { %704 = vst.msk [vmem:[%s2733_s21 + $0x82] sm:$0x1] %vm670_vm0, %v447_v42  ;;  %705 = vst.msk [vmem:[%s2733_s21 + $0x84] sm:$0x1] %vm670_vm0, %v455_v43  ;;  %v456_v54 = vcombine.high %v440_v44, %v440_v44  ;;  %v204_v56 = vsel %vm196_vm7, %v2849_v41, 0.0  ;;  %v482_v57 = vrot.slane %v466_v48, %v2676_v6  ;;  %v474_v58 = vcombine.high %v466_v48, %v466_v48 }
  0x2a   : > { %707 = vst.msk [vmem:[%s2733_s21 + $0x88] sm:$0x1] %vm670_vm0, %v440_v44  ;;  %702 = vst.msk [vmem:[%s2733_s21 + $0x6e] sm:$0x1] %vm670_vm0, %v409_v47  ;;  %v473_v59 = vrot.slane %v459_v49, %v2676_v6  ;;  %v515_v60 = vrot.slane %v204_v56, %v2676_v6  ;;  %v458_v62 = vcombine.high %v454_v53, %v454_v53 }
  0x2b   : > { %706 = vst.msk [vmem:[%s2733_s21 + $0x86] sm:$0x1] %vm670_vm0, %v457_v52  ;;  %708 = vst.msk [vmem:[%s2733_s21 + $0x8a] sm:$0x1] %vm670_vm0, %v454_v53  ;;  %v508_v0 = vcombine.high %v204_v56, %v204_v56  ;;  %vm197_vm8 = vcmp.eq.s32.totalorder %v2867_v51, %v2725_v21  ;;  %v496_v2 = vrot.slane %v474_v58, %v2676_v6 }
  0x2c   : > { %709 = vst.msk [vmem:[%s2733_s21 + $0x8c] sm:$0x1] %vm670_vm0, %v456_v54  ;;  %711 = vst.msk [vmem:[%s2733_s21 + $0xa0] sm:$0x1] %vm670_vm0, %v482_v57  ;;  %v504_v3 = vcombine.high %v482_v57, %v482_v57  ;;  %v489_v4 = vrot.slane %v473_v59, %v2676_v6  ;;  %v475_v19 = vcombine.high %v473_v59, %v473_v59  ;;  %v205_v25 = vsel %vm197_vm8, %v2883_v61, 0.0 }
  0x2d   : > { %710 = vst.msk [vmem:[%s2733_s21 + $0x8e] sm:$0x1] %vm670_vm0, %v458_v62  ;;  %v531_v22 = vrot.slane %v515_v60, %v2676_v6  ;;  %v523_v23 = vcombine.high %v515_v60, %v515_v60  ;;  %v522_v24 = vrot.slane %v508_v0, %v2676_v6  ;;  %712 = vst.msk [vmem:[%s2733_s21 + $0xa2] sm:$0x1] %vm670_vm0, %v496_v2  ;;  %v736_v54 = vadd.s32 1, %v2688_v10 }
  0x2e   : > { %713 = vst.msk [vmem:[%s2733_s21 + $0xa4] sm:$0x1] %vm670_vm0, %v504_v3  ;;  %v506_v26 = vcombine.high %v496_v2, %v496_v2  ;;  %715 = vst.msk [vmem:[%s2733_s21 + $0xa8] sm:$0x1] %vm670_vm0, %v489_v4  ;;  %v503_v28 = vrot.slane %v475_v19, %v2676_v6  ;;  %v505_v29 = vcombine.high %v489_v4, %v489_v4  ;;  %v737_v59 = vadd.s32 1, %v2691_v11 }
  0x2f   : > { %v564_v30 = vrot.slane %v205_v25, %v2676_v6  ;;  %719 = vst.msk [vmem:[%s2733_s21 + $0xc0] sm:$0x1] %vm670_vm0, %v531_v22  ;;  %v545_v31 = vrot.slane %v523_v23, %v2676_v6  ;;  %v553_v32 = vcombine.high %v531_v22, %v531_v22  ;;  %v538_v33 = vrot.slane %v522_v24, %v2676_v6 }
  0x30   : > { %v524_v34 = vcombine.high %v522_v24, %v522_v24  ;;  %714 = vst.msk [vmem:[%s2733_s21 + $0xa6] sm:$0x1] %vm670_vm0, %v506_v26  ;;  %716 = vst.msk [vmem:[%s2733_s21 + $0xaa] sm:$0x1] %vm670_vm0, %v503_v28  ;;  %v507_v35 = vcombine.high %v503_v28, %v503_v28  ;;  %v557_v39 = vcombine.high %v205_v25, %v205_v25 }
  0x31   : > { %717 = vst.msk [vmem:[%s2733_s21 + $0xac] sm:$0x1] %vm670_vm0, %v505_v29  ;;  %v580_v37 = vrot.slane %v564_v30, %v2676_v6  ;;  %v572_v38 = vcombine.high %v564_v30, %v564_v30  ;;  %720 = vst.msk [vmem:[%s2733_s21 + $0xc2] sm:$0x1] %vm670_vm0, %v545_v31  ;;  %v555_v40 = vcombine.high %v545_v31, %v545_v31 }
  0x32   : > { %721 = vst.msk [vmem:[%s2733_s21 + $0xc4] sm:$0x1] %vm670_vm0, %v553_v32  ;;  %723 = vst.msk [vmem:[%s2733_s21 + $0xc8] sm:$0x1] %vm670_vm0, %v538_v33  ;;  %v552_v42 = vrot.slane %v524_v34, %v2676_v6  ;;  %v554_v43 = vcombine.high %v538_v33, %v538_v33  ;;  %vm743_vm9 = vcmp.eq.s32.totalorder %v2682_v8, %v735_v1 }
  0x33   : > { %718 = vst.msk [vmem:[%s2733_s21 + $0xae] sm:$0x1] %vm670_vm0, %v507_v35  ;;  %727 = vst.msk [vmem:[%s2733_s21 + $0xe0] sm:$0x1] %vm670_vm0, %v580_v37  ;;  %v594_v44 = vrot.slane %v572_v38, %v2676_v6  ;;  %v602_v46 = vcombine.high %v580_v37, %v580_v37  ;;  %v571_v47 = vrot.slane %v557_v39, %v2676_v6  ;;  %v751_v48 = vsel %vm743_vm9, %v2679_v7, 0.0 }
  0x34   : > { %722 = vst.msk [vmem:[%s2733_s21 + $0xc6] sm:$0x1] %vm670_vm0, %v555_v40  ;;  %724 = vst.msk [vmem:[%s2733_s21 + $0xca] sm:$0x1] %vm670_vm0, %v552_v42  ;;  %v556_v49 = vcombine.high %v552_v42, %v552_v42  ;;  %v774_v52 = vrot.slane %v751_v48, %v2676_v6  ;;  %v767_v53 = vcombine.high %v751_v48, %v751_v48  ;;  %v738_v42 = vadd.s32 1, %v2694_v12 }
  0x35   : > { %725 = vst.msk [vmem:[%s2733_s21 + $0xcc] sm:$0x1] %vm670_vm0, %v554_v43  ;;  %728 = vst.msk [vmem:[%s2733_s21 + $0xe2] sm:$0x1] %vm670_vm0, %v594_v44  ;;  %v604_v56 = vcombine.high %v594_v44, %v594_v44  ;;  %v587_v57 = vrot.slane %v571_v47, %v2676_v6  ;;  %v573_v58 = vcombine.high %v571_v47, %v571_v47 }
  0x36   : > { %729 = vst.msk [vmem:[%s2733_s21 + $0xe4] sm:$0x1] %vm670_vm0, %v602_v46  ;;  %726 = vst.msk [vmem:[%s2733_s21 + $0xce] sm:$0x1] %vm670_vm0, %v556_v49  ;;  %v790_v60 = vrot.slane %v774_v52, %v2676_v6  ;;  %v782_v62 = vcombine.high %v774_v52, %v774_v52  ;;  %v781_v0 = vrot.slane %v767_v53, %v2676_v6 }
  0x37   : > { %vm744_vm10 = vcmp.eq.s32.totalorder %v2699_v13, %v736_v54  ;;  %730 = vst.msk [vmem:[%s2733_s21 + $0xe6] sm:$0x1] %vm670_vm0, %v604_v56  ;;  %731 = vst.msk [vmem:[%s2733_s21 + $0xe8] sm:$0x1] %vm670_vm0, %v587_v57  ;;  %v601_v1 = vrot.slane %v573_v58, %v2676_v6  ;;  %v603_v2 = vcombine.high %v587_v57, %v587_v57 }
  0x38   : > { %v752_v3 = vsel %vm744_vm10, %v2685_v9, 0.0  ;;  %vm745_vm11 = vcmp.eq.s32.totalorder %v2705_v15, %v737_v59  ;;  %1223 = vst.msk [vmem:[%s2733_s21 + $0x1] sm:$0x1] %vm670_vm0, %v790_v60  ;;  %v804_v4 = vrot.slane %v782_v62, %v2676_v6  ;;  %v812_v19 = vcombine.high %v790_v60, %v790_v60 }
  0x39   : > { %v797_v22 = vrot.slane %v781_v0, %v2676_v6  ;;  %v783_v23 = vcombine.high %v781_v0, %v781_v0  ;;  %732 = vst.msk [vmem:[%s2733_s21 + $0xea] sm:$0x1] %vm670_vm0, %v601_v1  ;;  %733 = vst.msk [vmem:[%s2733_s21 + $0xec] sm:$0x1] %vm670_vm0, %v603_v2  ;;  %v605_v24 = vcombine.high %v601_v1, %v601_v1  ;;  %v753_v28 = vsel %vm745_vm11, %v2702_v14, 0.0 }
  0x3a   : > { %v823_v25 = vrot.slane %v752_v3, %v2676_v6  ;;  %v816_v26 = vcombine.high %v752_v3, %v752_v3  ;;  %1224 = vst.msk [vmem:[%s2733_s21 + $0x3] sm:$0x1] %vm670_vm0, %v804_v4  ;;  %1225 = vst.msk [vmem:[%s2733_s21 + $0x5] sm:$0x1] %vm670_vm0, %v812_v19  ;;  %v814_v29 = vcombine.high %v804_v4, %v804_v4  ;;  %v739_v2 = vadd.s32 1, %v2708_v16 }
  0x3b   : > { %1227 = vst.msk [vmem:[%s2733_s21 + $0x9] sm:$0x1] %vm670_vm0, %v797_v22  ;;  %v811_v30 = vrot.slane %v783_v23, %v2676_v6  ;;  %v813_v31 = vcombine.high %v797_v22, %v797_v22  ;;  %v872_v32 = vrot.slane %v753_v28, %v2676_v6  ;;  %734 = vst.msk [vmem:[%s2733_s21 + $0xee] sm:$0x1] %vm670_vm0, %v605_v24  ;;  %v740_v3 = vadd.s32 1, %v2711_v17 }
  0x3c   : > { %v839_v33 = vrot.slane %v823_v25, %v2676_v6  ;;  %v831_v34 = vcombine.high %v823_v25, %v823_v25  ;;  %v830_v35 = vrot.slane %v816_v26, %v2676_v6  ;;  %v865_v37 = vcombine.high %v753_v28, %v753_v28  ;;  %1226 = vst.msk [vmem:[%s2733_s21 + $0x7] sm:$0x1] %vm670_vm0, %v814_v29 }
  0x3d   : > { %1228 = vst.msk [vmem:[%s2733_s21 + $0xb] sm:$0x1] %vm670_vm0, %v811_v30  ;;  %1229 = vst.msk [vmem:[%s2733_s21 + $0xd] sm:$0x1] %vm670_vm0, %v813_v31  ;;  %v815_v38 = vcombine.high %v811_v30, %v811_v30  ;;  %v888_v39 = vrot.slane %v872_v32, %v2676_v6  ;;  %v880_v40 = vcombine.high %v872_v32, %v872_v32  ;;  %v741_v25 = vadd.s32 1, %v2714_v18 }
  0x3e   : > { %1231 = vst.msk [vmem:[%s2733_s21 + $0x21] sm:$0x1] %vm670_vm0, %v839_v33  ;;  %v853_v43 = vrot.slane %v831_v34, %v2676_v6  ;;  %v861_v44 = vcombine.high %v839_v33, %v839_v33  ;;  %v846_v46 = vrot.slane %v830_v35, %v2676_v6  ;;  %v832_v47 = vcombine.high %v830_v35, %v830_v35 }
  0x3f   : > { %1230 = vst.msk [vmem:[%s2733_s21 + $0xf] sm:$0x1] %vm670_vm0, %v815_v38  ;;  %1239 = vst.msk [vmem:[%s2733_s21 + $0x41] sm:$0x1] %vm670_vm0, %v888_v39  ;;  %v902_v48 = vrot.slane %v880_v40, %v2676_v6  ;;  %v910_v49 = vcombine.high %v888_v39, %v888_v39  ;;  %v879_v52 = vrot.slane %v865_v37, %v2676_v6  ;;  %v742_v38 = vadd.s32 1, %v2725_v21 }
  0x40   : > { %vm746_vm12 = vcmp.eq.s32.totalorder %v2722_v20, %v738_v42  ;;  %1232 = vst.msk [vmem:[%s2733_s21 + $0x23] sm:$0x1] %vm670_vm0, %v853_v43  ;;  %1233 = vst.msk [vmem:[%s2733_s21 + $0x25] sm:$0x1] %vm670_vm0, %v861_v44  ;;  %v863_v53 = vcombine.high %v853_v43, %v853_v43  ;;  %v860_v54 = vrot.slane %v832_v47, %v2676_v6 }
  0x41   : > { %1235 = vst.msk [vmem:[%s2733_s21 + $0x29] sm:$0x1] %vm670_vm0, %v846_v46  ;;  %v862_v56 = vcombine.high %v846_v46, %v846_v46  ;;  %v754_v57 = vsel %vm746_vm12, %v2755_v45, 0.0  ;;  %1240 = vst.msk [vmem:[%s2733_s21 + $0x43] sm:$0x1] %vm670_vm0, %v902_v48  ;;  %v912_v58 = vcombine.high %v902_v48, %v902_v48  ;;  %v895_v59 = vrot.slane %v879_v52, %v2676_v6 }
  0x42   : > { %1241 = vst.msk [vmem:[%s2733_s21 + $0x45] sm:$0x1] %vm670_vm0, %v910_v49  ;;  %v881_v60 = vcombine.high %v879_v52, %v879_v52  ;;  %v921_v62 = vrot.slane %v754_v57, %v2676_v6  ;;  %1234 = vst.msk [vmem:[%s2733_s21 + $0x27] sm:$0x1] %vm670_vm0, %v863_v53  ;;  %v864_v0 = vcombine.high %v860_v54, %v860_v54 }
  0x43   : > { %1236 = vst.msk [vmem:[%s2733_s21 + $0x2b] sm:$0x1] %vm670_vm0, %v860_v54  ;;  %1237 = vst.msk [vmem:[%s2733_s21 + $0x2d] sm:$0x1] %vm670_vm0, %v862_v56  ;;  %v914_v1 = vcombine.high %v754_v57, %v754_v57  ;;  %v911_v19 = vcombine.high %v895_v59, %v895_v59  ;;  %vm747_vm13 = vcmp.eq.s32.totalorder %v2765_v50, %v739_v2 }
  0x44   : > { %1242 = vst.msk [vmem:[%s2733_s21 + $0x47] sm:$0x1] %vm670_vm0, %v912_v58  ;;  %1243 = vst.msk [vmem:[%s2733_s21 + $0x49] sm:$0x1] %vm670_vm0, %v895_v59  ;;  %v909_v4 = vrot.slane %v881_v60, %v2676_v6  ;;  %v937_v22 = vrot.slane %v921_v62, %v2676_v6  ;;  %v929_v23 = vcombine.high %v921_v62, %v921_v62  ;;  %v755_v30 = vsel %vm747_vm13, %v2775_v55, 0.0 }
  0x45   : > { %1238 = vst.msk [vmem:[%s2733_s21 + $0x2f] sm:$0x1] %vm670_vm0, %v864_v0  ;;  %v928_v24 = vrot.slane %v914_v1, %v2676_v6  ;;  %vm748_vm14 = vcmp.eq.s32.totalorder %v2801_v63, %v740_v3  ;;  %1245 = vst.msk [vmem:[%s2733_s21 + $0x4d] sm:$0x1] %vm670_vm0, %v911_v19  ;;  %v970_v33 = vrot.slane %v755_v30, %v2676_v6 }
  0x46   : > { %1244 = vst.msk [vmem:[%s2733_s21 + $0x4b] sm:$0x1] %vm670_vm0, %v909_v4  ;;  %v913_v26 = vcombine.high %v909_v4, %v909_v4  ;;  %1247 = vst.msk [vmem:[%s2733_s21 + $0x61] sm:$0x1] %vm670_vm0, %v937_v22  ;;  %v951_v28 = vrot.slane %v929_v23, %v2676_v6  ;;  %v959_v29 = vcombine.high %v937_v22, %v937_v22  ;;  %v756_v37 = vsel %vm748_vm14, %v2820_v27, 0.0 }
  0x47   : > { %v944_v31 = vrot.slane %v928_v24, %v2676_v6  ;;  %v930_v32 = vcombine.high %v928_v24, %v928_v24  ;;  %v963_v34 = vcombine.high %v755_v30, %v755_v30  ;;  %vm749_vm15 = vcmp.eq.s32.totalorder %v2835_v36, %v741_v25 }
  0x48   : > { %1246 = vst.msk [vmem:[%s2733_s21 + $0x4f] sm:$0x1] %vm670_vm0, %v913_v26  ;;  %1248 = vst.msk [vmem:[%s2733_s21 + $0x63] sm:$0x1] %vm670_vm0, %v951_v28  ;;  %v961_v35 = vcombine.high %v951_v28, %v951_v28  ;;  %v986_v42 = vrot.slane %v970_v33, %v2676_v6  ;;  %v978_v43 = vcombine.high %v970_v33, %v970_v33  ;;  %v757_v48 = vsel %vm749_vm15, %v2849_v41, 0.0 }
  0x49   : > { %1249 = vst.msk [vmem:[%s2733_s21 + $0x65] sm:$0x1] %vm670_vm0, %v959_v29  ;;  %1251 = vst.msk [vmem:[%s2733_s21 + $0x69] sm:$0x1] %vm670_vm0, %v944_v31  ;;  %v958_v39 = vrot.slane %v930_v32, %v2676_v6  ;;  %v960_v40 = vcombine.high %v944_v31, %v944_v31  ;;  %v977_v44 = vrot.slane %v963_v34, %v2676_v6 }
  0x4a   : > { %1250 = vst.msk [vmem:[%s2733_s21 + $0x67] sm:$0x1] %vm670_vm0, %v961_v35  ;;  %v1019_v46 = vrot.slane %v756_v37, %v2676_v6  ;;  %v1012_v47 = vcombine.high %v756_v37, %v756_v37  ;;  %1255 = vst.msk [vmem:[%s2733_s21 + $0x81] sm:$0x1] %vm670_vm0, %v986_v42  ;;  %v1000_v52 = vrot.slane %v978_v43, %v2676_v6  ;;  %v3131_v43 = vadd.s32 16, %v2694_v12 }
  0x4b   : > { %1252 = vst.msk [vmem:[%s2733_s21 + $0x6b] sm:$0x1] %vm670_vm0, %v958_v39  ;;  %1253 = vst.msk [vmem:[%s2733_s21 + $0x6d] sm:$0x1] %vm670_vm0, %v960_v40  ;;  %v962_v49 = vcombine.high %v958_v39, %v958_v39  ;;  %v1008_v53 = vcombine.high %v986_v42, %v986_v42  ;;  %v1068_v54 = vrot.slane %v757_v48, %v2676_v6  ;;  %v1288_v40 = vadd.s32 16, %v2688_v10 }
  0x4c   : > { %v993_v56 = vrot.slane %v977_v44, %v2676_v6  ;;  %v979_v57 = vcombine.high %v977_v44, %v977_v44  ;;  %v1035_v58 = vrot.slane %v1019_v46, %v2676_v6  ;;  %v1027_v59 = vcombine.high %v1019_v46, %v1019_v46  ;;  %1256 = vst.msk [vmem:[%s2733_s21 + $0x83] sm:$0x1] %vm670_vm0, %v1000_v52 }
  0x4d   : > { %1254 = vst.msk [vmem:[%s2733_s21 + $0x6f] sm:$0x1] %vm670_vm0, %v962_v49  ;;  %1257 = vst.msk [vmem:[%s2733_s21 + $0x85] sm:$0x1] %vm670_vm0, %v1008_v53  ;;  %v1010_v60 = vcombine.high %v1000_v52, %v1000_v52  ;;  %v1026_v62 = vrot.slane %v1012_v47, %v2676_v6  ;;  %v1084_v0 = vrot.slane %v1068_v54, %v2676_v6  ;;  %v1289_v42 = vadd.s32 16, %v2691_v11 }
  0x4e   : > { %v1076_v1 = vcombine.high %v1068_v54, %v1068_v54  ;;  %1259 = vst.msk [vmem:[%s2733_s21 + $0x89] sm:$0x1] %vm670_vm0, %v993_v56  ;;  %v1007_v2 = vrot.slane %v979_v57, %v2676_v6  ;;  %v1009_v3 = vcombine.high %v993_v56, %v993_v56  ;;  %1263 = vst.msk [vmem:[%s2733_s21 + $0xa1] sm:$0x1] %vm670_vm0, %v1035_v58 }
  0x4f   : > { %v1049_v4 = vrot.slane %v1027_v59, %v2676_v6  ;;  %v1057_v19 = vcombine.high %v1035_v58, %v1035_v58  ;;  %1258 = vst.msk [vmem:[%s2733_s21 + $0x87] sm:$0x1] %vm670_vm0, %v1010_v60  ;;  %v1042_v22 = vrot.slane %v1026_v62, %v2676_v6  ;;  %v1028_v23 = vcombine.high %v1026_v62, %v1026_v62 }
  0x50   : > { %1271 = vst.msk [vmem:[%s2733_s21 + $0xc1] sm:$0x1] %vm670_vm0, %v1084_v0  ;;  %v1098_v24 = vrot.slane %v1076_v1, %v2676_v6  ;;  %v1106_v25 = vcombine.high %v1084_v0, %v1084_v0  ;;  %1260 = vst.msk [vmem:[%s2733_s21 + $0x8b] sm:$0x1] %vm670_vm0, %v1007_v2  ;;  %v1011_v26 = vcombine.high %v1007_v2, %v1007_v2 }
  0x51   : > { %1261 = vst.msk [vmem:[%s2733_s21 + $0x8d] sm:$0x1] %vm670_vm0, %v1009_v3  ;;  %1264 = vst.msk [vmem:[%s2733_s21 + $0xa3] sm:$0x1] %vm670_vm0, %v1049_v4  ;;  %v1059_v28 = vcombine.high %v1049_v4, %v1049_v4  ;;  %v1061_v29 = vcombine.high %v757_v48, %v757_v48  ;;  %vm750_vm1 = vcmp.eq.s32.totalorder %v2867_v51, %v742_v38  ;;  %v1287_v38 = vadd.s32 16, %v2664_v5 }
  0x52   : > { %1265 = vst.msk [vmem:[%s2733_s21 + $0xa5] sm:$0x1] %vm670_vm0, %v1057_v19  ;;  %1267 = vst.msk [vmem:[%s2733_s21 + $0xa9] sm:$0x1] %vm670_vm0, %v1042_v22  ;;  %v1056_v30 = vrot.slane %v1028_v23, %v2676_v6  ;;  %v1058_v31 = vcombine.high %v1042_v22, %v1042_v22  ;;  %v1108_v32 = vcombine.high %v1098_v24, %v1098_v24  ;;  %v758_v33 = vsel %vm750_vm1, %v2883_v61, 0.0 }
  0x53   : > { %1272 = vst.msk [vmem:[%s2733_s21 + $0xc3] sm:$0x1] %vm670_vm0, %v1098_v24  ;;  %1273 = vst.msk [vmem:[%s2733_s21 + $0xc5] sm:$0x1] %vm670_vm0, %v1106_v25  ;;  %v1075_v34 = vrot.slane %v1061_v29, %v2676_v6  ;;  %v1117_v35 = vrot.slane %v758_v33, %v2676_v6  ;;  %v1110_v37 = vcombine.high %v758_v33, %v758_v33 }
  0x54   : > { %1262 = vst.msk [vmem:[%s2733_s21 + $0x8f] sm:$0x1] %vm670_vm0, %v1011_v26  ;;  %1266 = vst.msk [vmem:[%s2733_s21 + $0xa7] sm:$0x1] %vm670_vm0, %v1059_v28  ;;  %v1060_v39 = vcombine.high %v1056_v30, %v1056_v30  ;;  %vm1295_vm2 = vcmp.eq.s32.totalorder %v2682_v8, %v1287_v38  ;;  %vm1296_vm3 = vcmp.eq.s32.totalorder %v2699_v13, %v1288_v40 }
  0x55   : > { %1268 = vst.msk [vmem:[%s2733_s21 + $0xab] sm:$0x1] %vm670_vm0, %v1056_v30  ;;  %1269 = vst.msk [vmem:[%s2733_s21 + $0xad] sm:$0x1] %vm670_vm0, %v1058_v31  ;;  %v1091_v44 = vrot.slane %v1075_v34, %v2676_v6  ;;  %v1077_v46 = vcombine.high %v1075_v34, %v1075_v34  ;;  %v1133_v47 = vrot.slane %v1117_v35, %v2676_v6  ;;  %v1303_v13 = vsel %vm1295_vm2, %v2679_v7, 0.0 }
  0x56   : > { %1274 = vst.msk [vmem:[%s2733_s21 + $0xc7] sm:$0x1] %vm670_vm0, %v1108_v32  ;;  %v1125_v48 = vcombine.high %v1117_v35, %v1117_v35  ;;  %1270 = vst.msk [vmem:[%s2733_s21 + $0xaf] sm:$0x1] %vm670_vm0, %v1060_v39  ;;  %v1124_v49 = vrot.slane %v1110_v37, %v2676_v6  ;;  %vm1297_vm4 = vcmp.eq.s32.totalorder %v2705_v15, %v1289_v42  ;;  %v1304_v58 = vsel %vm1296_vm3, %v2685_v9, 0.0 }
  0x57   : > { %1275 = vst.msk [vmem:[%s2733_s21 + $0xc9] sm:$0x1] %vm670_vm0, %v1091_v44  ;;  %v1105_v52 = vrot.slane %v1077_v46, %v2676_v6  ;;  %v1107_v53 = vcombine.high %v1091_v44, %v1091_v44  ;;  %1279 = vst.msk [vmem:[%s2733_s21 + $0xe1] sm:$0x1] %vm670_vm0, %v1133_v47  ;;  %v1155_v56 = vcombine.high %v1133_v47, %v1133_v47  ;;  %v1305_v22 = vsel %vm1297_vm4, %v2702_v14, 0.0 }
  0x58   : > { %v1147_v54 = vrot.slane %v1125_v48, %v2676_v6  ;;  %v1140_v57 = vrot.slane %v1124_v49, %v2676_v6  ;;  %v1126_v8 = vcombine.high %v1124_v49, %v1124_v49  ;;  %v1326_v62 = vrot.slane %v1303_v13, %v2676_v6 }
  0x59   : > { %1276 = vst.msk [vmem:[%s2733_s21 + $0xcb] sm:$0x1] %vm670_vm0, %v1105_v52  ;;  %1277 = vst.msk [vmem:[%s2733_s21 + $0xcd] sm:$0x1] %vm670_vm0, %v1107_v53  ;;  %v1109_v59 = vcombine.high %v1105_v52, %v1105_v52  ;;  %v1319_v0 = vcombine.high %v1303_v13, %v1303_v13  ;;  %v1375_v1 = vrot.slane %v1304_v58, %v2676_v6  ;;  %v1292_v13 = vadd.s32 16, %v2711_v17 }
  0x5a   : > { %1280 = vst.msk [vmem:[%s2733_s21 + $0xe3] sm:$0x1] %vm670_vm0, %v1147_v54  ;;  %1281 = vst.msk [vmem:[%s2733_s21 + $0xe5] sm:$0x1] %vm670_vm0, %v1155_v56  ;;  %v1157_v60 = vcombine.high %v1147_v54, %v1147_v54  ;;  %v1154_v7 = vrot.slane %v1126_v8, %v2676_v6  ;;  %v1156_v9 = vcombine.high %v1140_v57, %v1140_v57  ;;  %v1291_v54 = vadd.s32 16, %v2708_v16 }
  0x5b   : > { %1283 = vst.msk [vmem:[%s2733_s21 + $0xe9] sm:$0x1] %vm670_vm0, %v1140_v57  ;;  %v1368_v2 = vcombine.high %v1304_v58, %v1304_v58  ;;  %1278 = vst.msk [vmem:[%s2733_s21 + $0xcf] sm:$0x1] %vm670_vm0, %v1109_v59  ;;  %v1342_v3 = vrot.slane %v1326_v62, %v2676_v6  ;;  %v1334_v4 = vcombine.high %v1326_v62, %v1326_v62 }
  0x5c   : > { %1282 = vst.msk [vmem:[%s2733_s21 + $0xe7] sm:$0x1] %vm670_vm0, %v1157_v60  ;;  %v1333_v19 = vrot.slane %v1319_v0, %v2676_v6  ;;  %1284 = vst.msk [vmem:[%s2733_s21 + $0xeb] sm:$0x1] %vm670_vm0, %v1154_v7  ;;  %v1158_v23 = vcombine.high %v1154_v7, %v1154_v7  ;;  %v1391_v24 = vrot.slane %v1375_v1, %v2676_v6 }
  0x5d   : > { %1285 = vst.msk [vmem:[%s2733_s21 + $0xed] sm:$0x1] %vm670_vm0, %v1156_v9  ;;  %v1383_v25 = vcombine.high %v1375_v1, %v1375_v1  ;;  %v1382_v26 = vrot.slane %v1368_v2, %v2676_v6  ;;  %2470 = vst.msk [vmem:[%s2733_s21 + $0x10] sm:$0x1] %vm670_vm0, %v1342_v3  ;;  %v1356_v28 = vrot.slane %v1334_v4, %v2676_v6 }
  0x5e   : > { %v1364_v29 = vcombine.high %v1342_v3, %v1342_v3  ;;  %v1349_v14 = vrot.slane %v1333_v19, %v2676_v6  ;;  %v1335_v15 = vcombine.high %v1333_v19, %v1333_v19  ;;  %1286 = vst.msk [vmem:[%s2733_s21 + $0xef] sm:$0x1] %vm670_vm0, %v1158_v23  ;;  %2478 = vst.msk [vmem:[%s2733_s21 + $0x30] sm:$0x1] %vm670_vm0, %v1391_v24 }
  0x5f   : > { %v1405_v30 = vrot.slane %v1383_v25, %v2676_v6  ;;  %v1413_v31 = vcombine.high %v1391_v24, %v1391_v24  ;;  %v1398_v32 = vrot.slane %v1382_v26, %v2676_v6  ;;  %v1384_v33 = vcombine.high %v1382_v26, %v1382_v26  ;;  %2471 = vst.msk [vmem:[%s2733_s21 + $0x12] sm:$0x1] %vm670_vm0, %v1356_v28 }
  0x60   : > { %2472 = vst.msk [vmem:[%s2733_s21 + $0x14] sm:$0x1] %vm670_vm0, %v1364_v29  ;;  %v1366_v34 = vcombine.high %v1356_v28, %v1356_v28  ;;  %2474 = vst.msk [vmem:[%s2733_s21 + $0x18] sm:$0x1] %vm670_vm0, %v1349_v14  ;;  %v1363_v35 = vrot.slane %v1335_v15, %v2676_v6  ;;  %v1365_v37 = vcombine.high %v1349_v14, %v1349_v14 }
  0x61   : > { %v1424_v38 = vrot.slane %v1305_v22, %v2676_v6  ;;  %2479 = vst.msk [vmem:[%s2733_s21 + $0x32] sm:$0x1] %vm670_vm0, %v1405_v30  ;;  %2480 = vst.msk [vmem:[%s2733_s21 + $0x34] sm:$0x1] %vm670_vm0, %v1413_v31  ;;  %v1415_v39 = vcombine.high %v1405_v30, %v1405_v30  ;;  %v1412_v40 = vrot.slane %v1384_v33, %v2676_v6  ;;  %v1293_v31 = vadd.s32 16, %v2714_v18 }
  0x62   : > { %2482 = vst.msk [vmem:[%s2733_s21 + $0x38] sm:$0x1] %vm670_vm0, %v1398_v32  ;;  %v1414_v42 = vcombine.high %v1398_v32, %v1398_v32  ;;  %v1417_v44 = vcombine.high %v1305_v22, %v1305_v22  ;;  %2473 = vst.msk [vmem:[%s2733_s21 + $0x16] sm:$0x1] %vm670_vm0, %v1366_v34  ;;  %v1367_v46 = vcombine.high %v1363_v35, %v1363_v35 }
  0x63   : > { %2475 = vst.msk [vmem:[%s2733_s21 + $0x1a] sm:$0x1] %vm670_vm0, %v1363_v35  ;;  %2476 = vst.msk [vmem:[%s2733_s21 + $0x1c] sm:$0x1] %vm670_vm0, %v1365_v37  ;;  %v1440_v47 = vrot.slane %v1424_v38, %v2676_v6  ;;  %v1432_v48 = vcombine.high %v1424_v38, %v1424_v38  ;;  %vm1298_vm5 = vcmp.eq.s32.totalorder %v2722_v20, %v3131_v43 }
  0x64   : > { %2481 = vst.msk [vmem:[%s2733_s21 + $0x36] sm:$0x1] %vm670_vm0, %v1415_v39  ;;  %2483 = vst.msk [vmem:[%s2733_s21 + $0x3a] sm:$0x1] %vm670_vm0, %v1412_v40  ;;  %v1416_v49 = vcombine.high %v1412_v40, %v1412_v40  ;;  %v1431_v52 = vrot.slane %v1417_v44, %v2676_v6  ;;  %v1306_v53 = vsel %vm1298_vm5, %v2755_v45, 0.0  ;;  %vm1299_vm6 = vcmp.eq.s32.totalorder %v2765_v50, %v1291_v54 }
  0x65   : > { %2484 = vst.msk [vmem:[%s2733_s21 + $0x3c] sm:$0x1] %vm670_vm0, %v1414_v42  ;;  %2477 = vst.msk [vmem:[%s2733_s21 + $0x1e] sm:$0x1] %vm670_vm0, %v1367_v46  ;;  %v1454_v20 = vrot.slane %v1432_v48, %v2676_v6  ;;  %v1462_v43 = vcombine.high %v1440_v47, %v1440_v47  ;;  %v1473_v56 = vrot.slane %v1306_v53, %v2676_v6  ;;  %v1307_v7 = vsel %vm1299_vm6, %v2775_v55, 0.0 }
  0x66   : > { %2486 = vst.msk [vmem:[%s2733_s21 + $0x50] sm:$0x1] %vm670_vm0, %v1440_v47  ;;  %v1466_v57 = vcombine.high %v1306_v53, %v1306_v53  ;;  %2485 = vst.msk [vmem:[%s2733_s21 + $0x3e] sm:$0x1] %vm670_vm0, %v1416_v49  ;;  %v1447_v8 = vrot.slane %v1431_v52, %v2676_v6  ;;  %v1433_v45 = vcombine.high %v1431_v52, %v1431_v52  ;;  %v1294_v53 = vadd.s32 16, %v2725_v21 }
  0x67   : > { %2487 = vst.msk [vmem:[%s2733_s21 + $0x52] sm:$0x1] %vm670_vm0, %v1454_v20  ;;  %2488 = vst.msk [vmem:[%s2733_s21 + $0x54] sm:$0x1] %vm670_vm0, %v1462_v43  ;;  %v1464_v58 = vcombine.high %v1454_v20, %v1454_v20  ;;  %v1489_v59 = vrot.slane %v1473_v56, %v2676_v6  ;;  %v1481_v60 = vcombine.high %v1473_v56, %v1473_v56  ;;  %v1840_v54 = vadd.s32 17, %v2664_v5  ;;  %v2612_v5 = vld [vmem:[%s2674_s18] sm:$0xff] }
  0x68   : > { %v1480_v62 = vrot.slane %v1466_v57, %v2676_v6  ;;  %2490 = vst.msk [vmem:[%s2733_s21 + $0x58] sm:$0x1] %vm670_vm0, %v1447_v8  ;;  %v1461_v0 = vrot.slane %v1433_v45, %v2676_v6  ;;  %v1463_v50 = vcombine.high %v1447_v8, %v1447_v8  ;;  %vm1300_vm7 = vcmp.eq.s32.totalorder %v2801_v63, %v1292_v13 }
  0x69   : > { %2489 = vst.msk [vmem:[%s2733_s21 + $0x56] sm:$0x1] %vm670_vm0, %v1464_v58  ;;  %2494 = vst.msk [vmem:[%s2733_s21 + $0x70] sm:$0x1] %vm670_vm0, %v1489_v59  ;;  %v1503_v9 = vrot.slane %v1481_v60, %v2676_v6  ;;  %v1511_v1 = vcombine.high %v1489_v59, %v1489_v59  ;;  %v1522_v55 = vrot.slane %v1307_v7, %v2676_v6  ;;  %v1308_v19 = vsel %vm1300_vm7, %v2820_v27, 0.0 }
  0x6a   : > { %v1496_v2 = vrot.slane %v1480_v62, %v2676_v6  ;;  %v1482_v3 = vcombine.high %v1480_v62, %v1480_v62  ;;  %2491 = vst.msk [vmem:[%s2733_s21 + $0x5a] sm:$0x1] %vm670_vm0, %v1461_v0  ;;  %2492 = vst.msk [vmem:[%s2733_s21 + $0x5c] sm:$0x1] %vm670_vm0, %v1463_v50  ;;  %v1465_v4 = vcombine.high %v1461_v0, %v1461_v0  ;;  %v1841_v45 = vadd.s32 17, %v2688_v10 }
  0x6b   : > { %v1515_v63 = vcombine.high %v1307_v7, %v1307_v7  ;;  %2495 = vst.msk [vmem:[%s2733_s21 + $0x72] sm:$0x1] %vm670_vm0, %v1503_v9  ;;  %2496 = vst.msk [vmem:[%s2733_s21 + $0x74] sm:$0x1] %vm670_vm0, %v1511_v1  ;;  %v1513_v22 = vcombine.high %v1503_v9, %v1503_v9  ;;  %v1571_v25 = vrot.slane %v1308_v19, %v2676_v6  ;;  %v2613_v7 = vld [vmem:[%s2669_s15] sm:$0xff]  ;;  %v1842_v1 = vadd.s32 17, %v2691_v11 }
  0x6c   : > { %2498 = vst.msk [vmem:[%s2733_s21 + $0x78] sm:$0x1] %vm670_vm0, %v1496_v2  ;;  %v1510_v23 = vrot.slane %v1482_v3, %v2676_v6  ;;  %v1512_v24 = vcombine.high %v1496_v2, %v1496_v2  ;;  %2493 = vst.msk [vmem:[%s2733_s21 + $0x5e] sm:$0x1] %vm670_vm0, %v1465_v4  ;;  %v1538_v26 = vrot.slane %v1522_v55, %v2676_v6 }
  0x6d   : > { %v1530_v28 = vcombine.high %v1522_v55, %v1522_v55  ;;  %v1529_v27 = vrot.slane %v1515_v63, %v2676_v6  ;;  %v1564_v29 = vcombine.high %v1308_v19, %v1308_v19  ;;  %2497 = vst.msk [vmem:[%s2733_s21 + $0x76] sm:$0x1] %vm670_vm0, %v1513_v22  ;;  %v1587_v15 = vrot.slane %v1571_v25, %v2676_v6 }
  0x6e   : > { %2499 = vst.msk [vmem:[%s2733_s21 + $0x7a] sm:$0x1] %vm670_vm0, %v1510_v23  ;;  %2500 = vst.msk [vmem:[%s2733_s21 + $0x7c] sm:$0x1] %vm670_vm0, %v1512_v24  ;;  %v1514_v14 = vcombine.high %v1510_v23, %v1510_v23  ;;  %v1579_v30 = vcombine.high %v1571_v25, %v1571_v25  ;;  %v1560_v33 = vcombine.high %v1538_v26, %v1538_v26  ;;  %v2615_v23 = vld [vmem:[%s2669_s15 + $0x8] sm:$0xff] }
  0x6f   : > { %2502 = vst.msk [vmem:[%s2733_s21 + $0x90] sm:$0x1] %vm670_vm0, %v1538_v26  ;;  %v1552_v32 = vrot.slane %v1530_v28, %v2676_v6  ;;  %v1545_v34 = vrot.slane %v1529_v27, %v2676_v6  ;;  %v1531_v35 = vcombine.high %v1529_v27, %v1529_v27  ;;  %2510 = vst.msk [vmem:[%s2733_s21 + $0xb0] sm:$0x1] %vm670_vm0, %v1587_v15 }
  0x70   : > { %2501 = vst.msk [vmem:[%s2733_s21 + $0x7e] sm:$0x1] %vm670_vm0, %v1514_v14  ;;  %v1601_v37 = vrot.slane %v1579_v30, %v2676_v6  ;;  %v1609_v38 = vcombine.high %v1587_v15, %v1587_v15  ;;  %v1578_v39 = vrot.slane %v1564_v29, %v2676_v6  ;;  %vm1301_vm8 = vcmp.eq.s32.totalorder %v2835_v36, %v1293_v31 }
  0x71   : > { %2503 = vst.msk [vmem:[%s2733_s21 + $0x92] sm:$0x1] %vm670_vm0, %v1552_v32  ;;  %2504 = vst.msk [vmem:[%s2733_s21 + $0x94] sm:$0x1] %vm670_vm0, %v1560_v33  ;;  %v1562_v40 = vcombine.high %v1552_v32, %v1552_v32  ;;  %v1559_v42 = vrot.slane %v1531_v35, %v2676_v6  ;;  %v1561_v44 = vcombine.high %v1545_v34, %v1545_v34  ;;  %v1309_v46 = vsel %vm1301_vm8, %v2849_v41, 0.0 }
  0x72   : > { %2506 = vst.msk [vmem:[%s2733_s21 + $0x98] sm:$0x1] %vm670_vm0, %v1545_v34  ;;  %2511 = vst.msk [vmem:[%s2733_s21 + $0xb2] sm:$0x1] %vm670_vm0, %v1601_v37  ;;  %v1611_v36 = vcombine.high %v1601_v37, %v1601_v37  ;;  %v1594_v47 = vrot.slane %v1578_v39, %v2676_v6  ;;  %v1580_v48 = vcombine.high %v1578_v39, %v1578_v39 }
  0x73   : > { %2512 = vst.msk [vmem:[%s2733_s21 + $0xb4] sm:$0x1] %vm670_vm0, %v1609_v38  ;;  %v1620_v49 = vrot.slane %v1309_v46, %v2676_v6  ;;  %2505 = vst.msk [vmem:[%s2733_s21 + $0x96] sm:$0x1] %vm670_vm0, %v1562_v40  ;;  %v1563_v52 = vcombine.high %v1559_v42, %v1559_v42  ;;  %v1613_v41 = vcombine.high %v1309_v46, %v1309_v46 }
  0x74   : > { %2507 = vst.msk [vmem:[%s2733_s21 + $0x9a] sm:$0x1] %vm670_vm0, %v1559_v42  ;;  %2508 = vst.msk [vmem:[%s2733_s21 + $0x9c] sm:$0x1] %vm670_vm0, %v1561_v44  ;;  %v1608_v20 = vrot.slane %v1580_v48, %v2676_v6  ;;  %v1610_v43 = vcombine.high %v1594_v47, %v1594_v47  ;;  %vm1302_vm9 = vcmp.eq.s32.totalorder %v2867_v51, %v1294_v53  ;;  %v2616_v48 = vld [vmem:[%s2674_s18 + $0x10] sm:$0xff] }
  0x75   : > { %2513 = vst.msk [vmem:[%s2733_s21 + $0xb6] sm:$0x1] %vm670_vm0, %v1611_v36  ;;  %2514 = vst.msk [vmem:[%s2733_s21 + $0xb8] sm:$0x1] %vm670_vm0, %v1594_v47  ;;  %v1636_v56 = vrot.slane %v1620_v49, %v2676_v6  ;;  %v1628_v57 = vcombine.high %v1620_v49, %v1620_v49  ;;  %v1627_v8 = vrot.slane %v1613_v41, %v2676_v6  ;;  %v1310_v51 = vsel %vm1302_vm9, %v2883_v61, 0.0  ;;  %v2614_v61 = vld [vmem:[%s2674_s18 + $0x8] sm:$0xff] }
  0x76   : > { %2509 = vst.msk [vmem:[%s2733_s21 + $0x9e] sm:$0x1] %vm670_vm0, %v1563_v52  ;;  %vm1848_vm10 = vcmp.eq.s32.totalorder %v2612_v5, %v1840_v54  ;;  %2515 = vst.msk [vmem:[%s2733_s21 + $0xba] sm:$0x1] %vm670_vm0, %v1608_v20  ;;  %v1612_v13 = vcombine.high %v1608_v20, %v1608_v20  ;;  %v1669_v10 = vrot.slane %v1310_v51, %v2676_v6  ;;  %v2617_v53 = vld [vmem:[%s2669_s15 + $0x10] sm:$0xff]  ;;  %v1844_v5 = vadd.s32 17, %v2708_v16 }
  0x77   : > { %2516 = vst.msk [vmem:[%s2733_s21 + $0xbc] sm:$0x1] %vm670_vm0, %v1610_v43  ;;  %2518 = vst.msk [vmem:[%s2733_s21 + $0xd0] sm:$0x1] %vm670_vm0, %v1636_v56  ;;  %v1650_v58 = vrot.slane %v1628_v57, %v2676_v6  ;;  %v1658_v59 = vcombine.high %v1636_v56, %v1636_v56  ;;  %v1643_v60 = vrot.slane %v1627_v8, %v2676_v6  ;;  %v1856_v9 = vsel %vm1848_vm10, %v2613_v7, 0.0  ;;  %v2619_v16 = vld [vmem:[%s2674_s18 + $0x20] sm:$0xff] }
  0x78   : > { %v1629_v62 = vcombine.high %v1627_v8, %v1627_v8  ;;  %v1662_v0 = vcombine.high %v1310_v51, %v1310_v51  ;;  %2517 = vst.msk [vmem:[%s2733_s21 + $0xbe] sm:$0x1] %vm670_vm0, %v1612_v13  ;;  %vm1849_vm11 = vcmp.eq.s32.totalorder %v2614_v61, %v1841_v45  ;;  %v1685_v4 = vrot.slane %v1669_v10, %v2676_v6  ;;  %v2621_v61 = vld [vmem:[%s2669_s15 + $0x18] sm:$0xff] }
  0x79   : > { %2519 = vst.msk [vmem:[%s2733_s21 + $0xd2] sm:$0x1] %vm670_vm0, %v1650_v58  ;;  %2520 = vst.msk [vmem:[%s2733_s21 + $0xd4] sm:$0x1] %vm670_vm0, %v1658_v59  ;;  %v1660_v50 = vcombine.high %v1650_v58, %v1650_v58  ;;  %v1659_v3 = vcombine.high %v1643_v60, %v1643_v60  ;;  %v1677_v55 = vcombine.high %v1669_v10, %v1669_v10  ;;  %v1857_v11 = vsel %vm1849_vm11, %v2615_v23, 0.0 }
  0x7a   : > { %2522 = vst.msk [vmem:[%s2733_s21 + $0xd8] sm:$0x1] %vm670_vm0, %v1643_v60  ;;  %v1657_v2 = vrot.slane %v1629_v62, %v2676_v6  ;;  %v1676_v63 = vrot.slane %v1662_v0, %v2676_v6  ;;  %v1879_v19 = vrot.slane %v1856_v9, %v2676_v6  ;;  %v1872_v22 = vcombine.high %v1856_v9, %v1856_v9  ;;  %v2618_v62 = vld [vmem:[%s2674_s18 + $0x18] sm:$0xff] }
  0x7b   : > { %2521 = vst.msk [vmem:[%s2733_s21 + $0xd6] sm:$0x1] %vm670_vm0, %v1660_v50  ;;  %2524 = vst.msk [vmem:[%s2733_s21 + $0xdc] sm:$0x1] %vm670_vm0, %v1659_v3  ;;  %v1699_v25 = vrot.slane %v1677_v55, %v2676_v6  ;;  %v1707_v26 = vcombine.high %v1685_v4, %v1685_v4  ;;  %v1928_v28 = vrot.slane %v1857_v11, %v2676_v6  ;;  %v1843_v57 = vadd.s32 17, %v2694_v12 }
  0x7c   : > { %2523 = vst.msk [vmem:[%s2733_s21 + $0xda] sm:$0x1] %vm670_vm0, %v1657_v2  ;;  %v1661_v24 = vcombine.high %v1657_v2, %v1657_v2  ;;  %2526 = vst.msk [vmem:[%s2733_s21 + $0xf0] sm:$0x1] %vm670_vm0, %v1685_v4  ;;  %v1692_v27 = vrot.slane %v1676_v63, %v2676_v6  ;;  %v1678_v29 = vcombine.high %v1676_v63, %v1676_v63  ;;  %v1845_v45 = vadd.s32 17, %v2711_v17  ;;  %v2620_v17 = vld [vmem:[%s2674_s18 + $0x28] sm:$0xff] }
  0x7d   : > { %v1895_v14 = vrot.slane %v1879_v19, %v2676_v6  ;;  %v1887_v15 = vcombine.high %v1879_v19, %v1879_v19  ;;  %2527 = vst.msk [vmem:[%s2733_s21 + $0xf2] sm:$0x1] %vm670_vm0, %v1699_v25  ;;  %2528 = vst.msk [vmem:[%s2733_s21 + $0xf4] sm:$0x1] %vm670_vm0, %v1707_v26  ;;  %v1709_v30 = vcombine.high %v1699_v25, %v1699_v25  ;;  %v3412_v13 = vadd.s32 17, %v2714_v18  ;;  %v2622_v2 = vld [vmem:[%s2669_s15 + $0x20] sm:$0xff] }
  0x7e   : > { %2525 = vst.msk [vmem:[%s2733_s21 + $0xde] sm:$0x1] %vm670_vm0, %v1661_v24  ;;  %v1886_v31 = vrot.slane %v1872_v22, %v2676_v6  ;;  %v1944_v32 = vrot.slane %v1928_v28, %v2676_v6  ;;  %v1936_v33 = vcombine.high %v1928_v28, %v1928_v28  ;;  %2530 = vst.msk [vmem:[%s2733_s21 + $0xf8] sm:$0x1] %vm670_vm0, %v1692_v27 }
  0x7f   : > { %v1706_v34 = vrot.slane %v1678_v29, %v2676_v6  ;;  %v1708_v35 = vcombine.high %v1692_v27, %v1692_v27  ;;  %2534 = vst.msk [vmem:[%s2733_s21 + $0x11] sm:$0x1] %vm670_vm0, %v1895_v14  ;;  %v1909_v37 = vrot.slane %v1887_v15, %v2676_v6  ;;  %v1917_v38 = vcombine.high %v1895_v14, %v1895_v14  ;;  %v2623_v27 = vld [vmem:[%s2669_s15 + $0x28] sm:$0xff] }
  0x80   : > { %2529 = vst.msk [vmem:[%s2733_s21 + $0xf6] sm:$0x1] %vm670_vm0, %v1709_v30  ;;  %v1902_v39 = vrot.slane %v1886_v31, %v2676_v6  ;;  %v1888_v40 = vcombine.high %v1886_v31, %v1886_v31  ;;  %2542 = vst.msk [vmem:[%s2733_s21 + $0x31] sm:$0x1] %vm670_vm0, %v1944_v32  ;;  %v1958_v42 = vrot.slane %v1936_v33, %v2676_v6 }
  0x81   : > { %v1966_v44 = vcombine.high %v1944_v32, %v1944_v32  ;;  %2531 = vst.msk [vmem:[%s2733_s21 + $0xfa] sm:$0x1] %vm670_vm0, %v1706_v34  ;;  %2532 = vst.msk [vmem:[%s2733_s21 + $0xfc] sm:$0x1] %vm670_vm0, %v1708_v35  ;;  %v1710_v46 = vcombine.high %v1706_v34, %v1706_v34  ;;  %v1919_v36 = vcombine.high %v1909_v37, %v1909_v37 }
  0x82   : > { %2535 = vst.msk [vmem:[%s2733_s21 + $0x13] sm:$0x1] %vm670_vm0, %v1909_v37  ;;  %2536 = vst.msk [vmem:[%s2733_s21 + $0x15] sm:$0x1] %vm670_vm0, %v1917_v38  ;;  %v1921_v47 = vcombine.high %v1857_v11, %v1857_v11  ;;  %vm1850_vm12 = vcmp.eq.s32.totalorder %v2616_v48, %v1842_v1  ;;  %v1916_v49 = vrot.slane %v1888_v40, %v2676_v6 }
  0x83   : > { %2538 = vst.msk [vmem:[%s2733_s21 + $0x19] sm:$0x1] %vm670_vm0, %v1902_v39  ;;  %v1918_v52 = vcombine.high %v1902_v39, %v1902_v39  ;;  %2543 = vst.msk [vmem:[%s2733_s21 + $0x33] sm:$0x1] %vm670_vm0, %v1958_v42  ;;  %v1968_v41 = vcombine.high %v1958_v42, %v1958_v42  ;;  %v1858_v54 = vsel %vm1850_vm12, %v2617_v53, 0.0  ;;  %vm1851_vm13 = vcmp.eq.s32.totalorder %v2618_v62, %v1843_v57  ;;  %v2625_v57 = vld [vmem:[%s2669_s15 + $0x30] sm:$0xff] }
  0x84   : > { %2544 = vst.msk [vmem:[%s2733_s21 + $0x35] sm:$0x1] %vm670_vm0, %v1966_v44  ;;  %2533 = vst.msk [vmem:[%s2733_s21 + $0xfe] sm:$0x1] %vm670_vm0, %v1710_v46  ;;  %v1935_v20 = vrot.slane %v1921_v47, %v2676_v6  ;;  %v1977_v43 = vrot.slane %v1858_v54, %v2676_v6  ;;  %v1970_v56 = vcombine.high %v1858_v54, %v1858_v54  ;;  %v1859_v1 = vsel %vm1851_vm13, %v2621_v61, 0.0 }
  0x85   : > { %2537 = vst.msk [vmem:[%s2733_s21 + $0x17] sm:$0x1] %vm670_vm0, %v1919_v36  ;;  %2539 = vst.msk [vmem:[%s2733_s21 + $0x1b] sm:$0x1] %vm670_vm0, %v1916_v49  ;;  %v1920_v8 = vcombine.high %v1916_v49, %v1916_v49  ;;  %vm1852_vm14 = vcmp.eq.s32.totalorder %v2619_v16, %v1844_v5  ;;  %vm1853_vm15 = vcmp.eq.s32.totalorder %v2620_v17, %v1845_v45  ;;  %v1847_v5 = vadd.s32 17, %v2725_v21  ;;  %v2626_v21 = vld [vmem:[%s2674_s18 + $0x38] sm:$0xff] }
  0x86   : > { %2540 = vst.msk [vmem:[%s2733_s21 + $0x1d] sm:$0x1] %vm670_vm0, %v1918_v52  ;;  %2545 = vst.msk [vmem:[%s2733_s21 + $0x37] sm:$0x1] %vm670_vm0, %v1968_v41  ;;  %v1951_v12 = vrot.slane %v1935_v20, %v2676_v6  ;;  %v1937_v58 = vcombine.high %v1935_v20, %v1935_v20  ;;  %v1993_v59 = vrot.slane %v1977_v43, %v2676_v6  ;;  %v1860_v3 = vsel %vm1852_vm14, %v2622_v2, 0.0  ;;  %v2624_v20 = vld [vmem:[%s2674_s18 + $0x30] sm:$0xff] }
  0x87   : > { %v1985_v51 = vcombine.high %v1977_v43, %v1977_v43  ;;  %2541 = vst.msk [vmem:[%s2733_s21 + $0x1f] sm:$0x1] %vm670_vm0, %v1920_v8  ;;  %v1984_v60 = vrot.slane %v1970_v56, %v2676_v6  ;;  %v2026_v63 = vrot.slane %v1859_v1, %v2676_v6  ;;  %v2019_v19 = vcombine.high %v1859_v1, %v1859_v1 }
  0x88   : > { %2546 = vst.msk [vmem:[%s2733_s21 + $0x39] sm:$0x1] %vm670_vm0, %v1951_v12  ;;  %v1965_v18 = vrot.slane %v1937_v58, %v2676_v6  ;;  %v1967_v10 = vcombine.high %v1951_v12, %v1951_v12  ;;  %2550 = vst.msk [vmem:[%s2733_s21 + $0x51] sm:$0x1] %vm670_vm0, %v1993_v59  ;;  %v2015_v50 = vcombine.high %v1993_v59, %v1993_v59  ;;  %v1861_v29 = vsel %vm1853_vm15, %v2623_v27, 0.0 }
  0x89   : > { %v2007_v0 = vrot.slane %v1985_v51, %v2676_v6  ;;  %v2000_v7 = vrot.slane %v1984_v60, %v2676_v6  ;;  %v1986_v9 = vcombine.high %v1984_v60, %v1984_v60  ;;  %v2075_v11 = vrot.slane %v1860_v3, %v2676_v6 }
  0x8a   : > { %2547 = vst.msk [vmem:[%s2733_s21 + $0x3b] sm:$0x1] %vm670_vm0, %v1965_v18  ;;  %2548 = vst.msk [vmem:[%s2733_s21 + $0x3d] sm:$0x1] %vm670_vm0, %v1967_v10  ;;  %v1969_v4 = vcombine.high %v1965_v18, %v1965_v18  ;;  %v2068_v24 = vcombine.high %v1860_v3, %v1860_v3  ;;  %v2042_v25 = vrot.slane %v2026_v63, %v2676_v6 }
  0x8b   : > { %2551 = vst.msk [vmem:[%s2733_s21 + $0x53] sm:$0x1] %vm670_vm0, %v2007_v0  ;;  %2552 = vst.msk [vmem:[%s2733_s21 + $0x55] sm:$0x1] %vm670_vm0, %v2015_v50  ;;  %v2017_v55 = vcombine.high %v2007_v0, %v2007_v0  ;;  %v2014_v22 = vrot.slane %v1986_v9, %v2676_v6  ;;  %v2016_v23 = vcombine.high %v2000_v7, %v2000_v7  ;;  %v2627_v0 = vld [vmem:[%s2669_s15 + $0x38] sm:$0xff] }
  0x8c   : > { %2554 = vst.msk [vmem:[%s2733_s21 + $0x59] sm:$0x1] %vm670_vm0, %v2000_v7  ;;  %2549 = vst.msk [vmem:[%s2733_s21 + $0x3f] sm:$0x1] %vm670_vm0, %v1969_v4  ;;  %v2034_v26 = vcombine.high %v2026_v63, %v2026_v63  ;;  %v2033_v28 = vrot.slane %v2019_v19, %v2676_v6  ;;  %v2091_v15 = vrot.slane %v2075_v11, %v2676_v6 }
  0x8d   : > { %2553 = vst.msk [vmem:[%s2733_s21 + $0x57] sm:$0x1] %vm670_vm0, %v2017_v55  ;;  %2555 = vst.msk [vmem:[%s2733_s21 + $0x5b] sm:$0x1] %vm670_vm0, %v2014_v22  ;;  %v2018_v14 = vcombine.high %v2014_v22, %v2014_v22  ;;  %v2083_v30 = vcombine.high %v2075_v11, %v2075_v11  ;;  %v2082_v31 = vrot.slane %v2068_v24, %v2676_v6 }
  0x8e   : > { %2556 = vst.msk [vmem:[%s2733_s21 + $0x5d] sm:$0x1] %vm670_vm0, %v2016_v23  ;;  %2558 = vst.msk [vmem:[%s2733_s21 + $0x71] sm:$0x1] %vm670_vm0, %v2042_v25  ;;  %v2056_v32 = vrot.slane %v2034_v26, %v2676_v6  ;;  %v2064_v33 = vcombine.high %v2042_v25, %v2042_v25  ;;  %v2049_v34 = vrot.slane %v2033_v28, %v2676_v6 }
  0x8f   : > { %v2035_v35 = vcombine.high %v2033_v28, %v2033_v28  ;;  %2557 = vst.msk [vmem:[%s2733_s21 + $0x5f] sm:$0x1] %vm670_vm0, %v2018_v14  ;;  %2566 = vst.msk [vmem:[%s2733_s21 + $0x91] sm:$0x1] %vm670_vm0, %v2091_v15  ;;  %v2105_v37 = vrot.slane %v2083_v30, %v2676_v6  ;;  %v2113_v38 = vcombine.high %v2091_v15, %v2091_v15 }
  0x90   : > { %v2098_v39 = vrot.slane %v2082_v31, %v2676_v6  ;;  %v2084_v40 = vcombine.high %v2082_v31, %v2082_v31  ;;  %2559 = vst.msk [vmem:[%s2733_s21 + $0x73] sm:$0x1] %vm670_vm0, %v2056_v32  ;;  %2560 = vst.msk [vmem:[%s2733_s21 + $0x75] sm:$0x1] %vm670_vm0, %v2064_v33  ;;  %v2066_v42 = vcombine.high %v2056_v32, %v2056_v32 }
  0x91   : > { %2562 = vst.msk [vmem:[%s2733_s21 + $0x79] sm:$0x1] %vm670_vm0, %v2049_v34  ;;  %v2063_v44 = vrot.slane %v2035_v35, %v2676_v6  ;;  %v2065_v46 = vcombine.high %v2049_v34, %v2049_v34  ;;  %v2124_v36 = vrot.slane %v1861_v29, %v2676_v6  ;;  %2567 = vst.msk [vmem:[%s2733_s21 + $0x93] sm:$0x1] %vm670_vm0, %v2105_v37 }
  0x92   : > { %2568 = vst.msk [vmem:[%s2733_s21 + $0x95] sm:$0x1] %vm670_vm0, %v2113_v38  ;;  %v2115_v47 = vcombine.high %v2105_v37, %v2105_v37  ;;  %2570 = vst.msk [vmem:[%s2733_s21 + $0x99] sm:$0x1] %vm670_vm0, %v2098_v39  ;;  %v2112_v48 = vrot.slane %v2084_v40, %v2676_v6  ;;  %v2114_v49 = vcombine.high %v2098_v39, %v2098_v39 }
  0x93   : > { %v2117_v52 = vcombine.high %v1861_v29, %v1861_v29  ;;  %2561 = vst.msk [vmem:[%s2733_s21 + $0x77] sm:$0x1] %vm670_vm0, %v2066_v42  ;;  %2563 = vst.msk [vmem:[%s2733_s21 + $0x7b] sm:$0x1] %vm670_vm0, %v2063_v44  ;;  %v2067_v41 = vcombine.high %v2063_v44, %v2063_v44  ;;  %v2140_v53 = vrot.slane %v2124_v36, %v2676_v6 }
  0x94   : > { %2564 = vst.msk [vmem:[%s2733_s21 + $0x7d] sm:$0x1] %vm670_vm0, %v2065_v46  ;;  %v2132_v54 = vcombine.high %v2124_v36, %v2124_v36  ;;  %vm1854_vm1 = vcmp.eq.s32.totalorder %v2624_v20, %v3412_v13  ;;  %2569 = vst.msk [vmem:[%s2733_s21 + $0x97] sm:$0x1] %vm670_vm0, %v2115_v47  ;;  %v2116_v43 = vcombine.high %v2112_v48, %v2112_v48 }
  0x95   : > { %2571 = vst.msk [vmem:[%s2733_s21 + $0x9b] sm:$0x1] %vm670_vm0, %v2112_v48  ;;  %2572 = vst.msk [vmem:[%s2733_s21 + $0x9d] sm:$0x1] %vm670_vm0, %v2114_v49  ;;  %v2131_v56 = vrot.slane %v2117_v52, %v2676_v6  ;;  %v1862_v8 = vsel %vm1854_vm1, %v2625_v57, 0.0  ;;  %v2162_v13 = vcombine.high %v2140_v53, %v2140_v53  ;;  %vm1855_vm2 = vcmp.eq.s32.totalorder %v2626_v21, %v1847_v5 }
  0x96   : > { %2565 = vst.msk [vmem:[%s2733_s21 + $0x7f] sm:$0x1] %vm670_vm0, %v2067_v41  ;;  %2574 = vst.msk [vmem:[%s2733_s21 + $0xb1] sm:$0x1] %vm670_vm0, %v2140_v53  ;;  %v2154_v45 = vrot.slane %v2132_v54, %v2676_v6  ;;  %v2173_v12 = vrot.slane %v1862_v8, %v2676_v6  ;;  %v2166_v58 = vcombine.high %v1862_v8, %v1862_v8  ;;  %v1863_v50 = vsel %vm1855_vm2, %v2627_v0, 0.0 }
  0x97   : > { %2573 = vst.msk [vmem:[%s2733_s21 + $0x9f] sm:$0x1] %vm670_vm0, %v2116_v43  ;;  %v2147_v59 = vrot.slane %v2131_v56, %v2676_v6  ;;  %v2133_v51 = vcombine.high %v2131_v56, %v2131_v56  ;;  %2576 = vst.msk [vmem:[%s2733_s21 + $0xb5] sm:$0x1] %vm670_vm0, %v2162_v13  ;;  %v2222_v3 = vrot.slane %v1863_v50, %v2676_v6 }
  0x98   : > { %2575 = vst.msk [vmem:[%s2733_s21 + $0xb3] sm:$0x1] %vm670_vm0, %v2154_v45  ;;  %v2164_v60 = vcombine.high %v2154_v45, %v2154_v45  ;;  %v2189_v62 = vrot.slane %v2173_v12, %v2676_v6  ;;  %v2181_v16 = vcombine.high %v2173_v12, %v2173_v12  ;;  %v2180_v17 = vrot.slane %v2166_v58, %v2676_v6 }
  0x99   : > { %2578 = vst.msk [vmem:[%s2733_s21 + $0xb9] sm:$0x1] %vm670_vm0, %v2147_v59  ;;  %v2161_v18 = vrot.slane %v2133_v51, %v2676_v6  ;;  %v2163_v10 = vcombine.high %v2147_v59, %v2147_v59  ;;  %v2215_v4 = vcombine.high %v1863_v50, %v1863_v50  ;;  %v2238_v22 = vrot.slane %v2222_v3, %v2676_v6 }
  0x9a   : > { %2577 = vst.msk [vmem:[%s2733_s21 + $0xb7] sm:$0x1] %vm670_vm0, %v2164_v60  ;;  %2582 = vst.msk [vmem:[%s2733_s21 + $0xd1] sm:$0x1] %vm670_vm0, %v2189_v62  ;;  %v2203_v7 = vrot.slane %v2181_v16, %v2676_v6  ;;  %v2211_v9 = vcombine.high %v2189_v62, %v2189_v62  ;;  %v2196_v61 = vrot.slane %v2180_v17, %v2676_v6 }
  0x9b   : > { %v2182_v1 = vcombine.high %v2180_v17, %v2180_v17  ;;  %2579 = vst.msk [vmem:[%s2733_s21 + $0xbb] sm:$0x1] %vm670_vm0, %v2161_v18  ;;  %2580 = vst.msk [vmem:[%s2733_s21 + $0xbd] sm:$0x1] %vm670_vm0, %v2163_v10  ;;  %v2165_v2 = vcombine.high %v2161_v18, %v2161_v18  ;;  %v2230_v23 = vcombine.high %v2222_v3, %v2222_v3 }
  0x9c   : > { %2583 = vst.msk [vmem:[%s2733_s21 + $0xd3] sm:$0x1] %vm670_vm0, %v2203_v7  ;;  %2584 = vst.msk [vmem:[%s2733_s21 + $0xd5] sm:$0x1] %vm670_vm0, %v2211_v9  ;;  %v2213_v55 = vcombine.high %v2203_v7, %v2203_v7  ;;  %v2212_v19 = vcombine.high %v2196_v61, %v2196_v61  ;;  %v2229_v11 = vrot.slane %v2215_v4, %v2676_v6 }
  0x9d   : > { %2586 = vst.msk [vmem:[%s2733_s21 + $0xd9] sm:$0x1] %vm670_vm0, %v2196_v61  ;;  %v2210_v63 = vrot.slane %v2182_v1, %v2676_v6  ;;  %2581 = vst.msk [vmem:[%s2733_s21 + $0xbf] sm:$0x1] %vm670_vm0, %v2165_v2  ;;  %v2252_v25 = vrot.slane %v2230_v23, %v2676_v6  ;;  %v2260_v26 = vcombine.high %v2238_v22, %v2238_v22 }
  0x9e   : > { %2585 = vst.msk [vmem:[%s2733_s21 + $0xd7] sm:$0x1] %vm670_vm0, %v2213_v55  ;;  %2588 = vst.msk [vmem:[%s2733_s21 + $0xdd] sm:$0x1] %vm670_vm0, %v2212_v19  ;;  %v2245_v28 = vrot.slane %v2229_v11, %v2676_v6  ;;  %v2231_v27 = vcombine.high %v2229_v11, %v2229_v11 }
  0x9f   : > { %2587 = vst.msk [vmem:[%s2733_s21 + $0xdb] sm:$0x1] %vm670_vm0, %v2210_v63  ;;  %v2214_v24 = vcombine.high %v2210_v63, %v2210_v63  ;;  %2590 = vst.msk [vmem:[%s2733_s21 + $0xf1] sm:$0x1] %vm670_vm0, %v2238_v22  ;;  %v2262_v29 = vcombine.high %v2252_v25, %v2252_v25 }
  0xa0   : > { %2591 = vst.msk [vmem:[%s2733_s21 + $0xf3] sm:$0x1] %vm670_vm0, %v2252_v25  ;;  %2592 = vst.msk [vmem:[%s2733_s21 + $0xf5] sm:$0x1] %vm670_vm0, %v2260_v26  ;;  %v2259_v14 = vrot.slane %v2231_v27, %v2676_v6  ;;  %v2261_v15 = vcombine.high %v2245_v28, %v2245_v28 }
  0xa1   : > { %2589 = vst.msk [vmem:[%s2733_s21 + $0xdf] sm:$0x1] %vm670_vm0, %v2214_v24  ;;  %2594 = vst.msk [vmem:[%s2733_s21 + $0xf9] sm:$0x1] %vm670_vm0, %v2245_v28 }
  0xa2   : > { %2593 = vst.msk [vmem:[%s2733_s21 + $0xf7] sm:$0x1] %vm670_vm0, %v2262_v29  ;;  %2595 = vst.msk [vmem:[%s2733_s21 + $0xfb] sm:$0x1] %vm670_vm0, %v2259_v14  ;;  %v2263_v30 = vcombine.high %v2259_v14, %v2259_v14 }
  0xa3   : > { %2596 = vst.msk [vmem:[%s2733_s21 + $0xfd] sm:$0x1] %vm670_vm0, %v2261_v15 }
  0xa4   : > { %2597 = vst.msk [vmem:[%s2733_s21 + $0xff] sm:$0x1] %vm670_vm0, %v2263_v30 }
  0xa5 PF: > { %s12_s9 = sadd.s32 1, %s2634_s9  }
  0xa6   : > { %p9_p4 = scmp.ge.s32.totalorder %s12_s9, 4  }
  0xa8   :  { %11 = sbr.rel (!%p9_p4) target bundleno = 1 (0x1), region = 62 }

</bundles_post_ra>
